<compile_context>
chip_gen: v6e
topology: v6e:2x2x1
jax: 0.10.0
libtpu: 0.0.40
codegen_flags: <defaults>
</compile_context>

<pallas_src>
import functools
import numpy as np

import jax
import jax.numpy as jnp
from jax import lax
from jax.experimental import pallas as pl
from jax.experimental.pallas import tpu as pltpu


def _round_up(x, m):
    return (x + m - 1) // m * m


def _pick_co_block(cout, h, w):
    """Output-channel block size keeping acc + temp planes within the vreg file."""
    plane_vregs = ((h + 7) // 8) * ((w + 127) // 128)   # vregs per f32 (h, w) plane
    budget = max(1, 56 // plane_vregs - 5)              # accs + x/xr/tap + iota planes
    cb = min(cout, budget)
    while cout % cb:                                    # keep it a divisor of cout
        cb -= 1
    return cb


# ---------------------------------------------------------------------------
# Fused conv(3x3, pad=1) + folded BatchNorm(eval) + ReLU [+ MaxPool(3, pad=1)]
# ---------------------------------------------------------------------------

def _conv_fused_kernel(Cin, H, W, pool_stride, co_blk,
                       w_ref, b_ref, x_ref, o_ref):
    """One (image, output-channel block) per grid step.

    w_ref : (Cout*Cin*9,) f32 SMEM (scalar prefetch), BN scale folded in.
    b_ref : (Cout,)       f32 SMEM (scalar prefetch), BN folded in.
    x_ref : (Cin, H, W)   VMEM, unpadded input planes (W on the lane axis).
    o_ref : (co_blk, Ho, Wo) VMEM output block.
    """
    co0 = pl.program_id(1) * co_blk

    # Row/column index planes; used to zero the one line that wraps around
    # after a roll.  This implements the conv's zero padding (and the pool's
    # border handling) exactly, with no host-side jnp.pad.
    rr = lax.broadcasted_iota(jnp.int32, (H, W), 0)
    cc = lax.broadcasted_iota(jnp.int32, (H, W), 1)

    def vshift(p, d):
        # t[i, j] = p[i + d, j]; zero where i + d is out of range (d in {-1,0,1}).
        if d == 0:
            return p
        t = pltpu.roll(p, (-d) % H, axis=0)            # XLU sublane rotate
        edge = (H - 1) if d == 1 else 0
        return jnp.where(rr == edge, 0.0, t)

    def hshift(p, d):
        # t[i, j] = p[i, j + d]; zero where j + d is out of range.
        if d == 0:
            return p
        t = pltpu.roll(p, (-d) % W, axis=1)            # XLU lane rotate
        edge = (W - 1) if d == 1 else 0
        cc_p = cc if p.shape[0] == H else cc[:p.shape[0], :]
        return jnp.where(cc_p == edge, 0.0, t)

    # --- direct 3x3 conv: co_blk accumulators live, taps built once per
    # --- (ci, kh, kw) with rolls and reused across the channel block.
    accs = [jnp.zeros((H, W), jnp.float32) for _ in range(co_blk)]
    for ci in range(Cin):
        x = x_ref[ci]
        for kh in range(3):
            xr = vshift(x, kh - 1)
            for kw in range(3):
                tap = hshift(xr, kw - 1)
                for c in range(co_blk):
                    wgt = w_ref[((co0 + c) * Cin + ci) * 9 + kh * 3 + kw]
                    accs[c] = accs[c] + tap * wgt

    # --- bias + ReLU (+ fused separable max-pool) ---------------------------
    if pool_stride == 2:
        Ho = (H - 1) // 2 + 1
        Wo = (W - 1) // 2 + 1
        # ::2 subsample expressed as two small one-hot matmuls (MXU is idle).
        rsel = (lax.broadcasted_iota(jnp.int32, (Ho, H), 1)
                == 2 * lax.broadcasted_iota(jnp.int32, (Ho, H), 0)
                ).astype(jnp.float32)
        csel = (lax.broadcasted_iota(jnp.int32, (W, Wo), 0)
                == 2 * lax.broadcasted_iota(jnp.int32, (W, Wo), 1)
                ).astype(jnp.float32)

    for c in range(co_blk):
        a = jnp.maximum(accs[c] + b_ref[co0 + c], 0.0)   # bias + ReLU
        if pool_stride == 0:
            o_ref[c] = a.astype(o_ref.dtype)
            continue
        # Separable 3x3 max-pool, kept in vregs.  Out-of-range taps are zeroed
        # by the shift masks, which is equivalent to ignoring them since a >= 0.
        v = jnp.maximum(a, jnp.maximum(vshift(a, -1), vshift(a, 1)))
        if pool_stride == 2:
            v = jnp.dot(rsel, v, preferred_element_type=jnp.float32)
        m = jnp.maximum(v, jnp.maximum(hshift(v, -1), hshift(v, 1)))
        if pool_stride == 2:
            m = jnp.dot(m, csel, preferred_element_type=jnp.float32)
        o_ref[c] = m.astype(o_ref.dtype)


def conv_bn_relu_pool(x_nchw, w_flat, b_flat, *, pool_stride):
    """pool_stride: 0 = no pooling, 1 or 2 = MaxPool2d(3, stride, padding=1)."""
    B, Cin, H, W = x_nchw.shape
    Cout = b_flat.shape[0]
    if pool_stride == 2:
        Ho, Wo = (H - 1) // 2 + 1, (W - 1) // 2 + 1
    else:
        Ho, Wo = H, W
    co_blk = _pick_co_block(Cout, H, W)
    n_cb = Cout // co_blk

    kernel = functools.partial(_conv_fused_kernel, Cin, H, W, pool_stride, co_blk)
    return pl.pallas_call(
        kernel,
        out_shape=jax.ShapeDtypeStruct((B, Cout, Ho, Wo), jnp.float32),
        grid_spec=pltpu.PrefetchScalarGridSpec(
            num_scalar_prefetch=2,          # conv weights + biases -> SMEM
            grid=(B, n_cb),
            in_specs=[pl.BlockSpec((None, Cin, H, W),
                                   lambda b, cb, *_: (b, 0, 0, 0))],
            out_specs=pl.BlockSpec((None, co_blk, Ho, Wo),
                                   lambda b, cb, *_: (b, cb, 0, 0)),
        ),
        compiler_params=pltpu.CompilerParams(
            dimension_semantics=("parallel", "parallel"),
            vmem_limit_bytes=32 * 1024 * 1024),
    )(w_flat, b_flat, x_nchw)


# ---------------------------------------------------------------------------
# Fused dense stack: tiled first linear + small tail linears + softmax
# ---------------------------------------------------------------------------

def _dense_stack_kernel(num_layers, n_classes, x_ref, *refs):
    o_ref, acc_ref = refs[-2], refs[-1]
    w_refs = refs[0:2 * num_layers:2]
    b_refs = refs[1:2 * num_layers:2]

    @pl.when(pl.program_id(0) == 0)
    def _():
        acc_ref[...] = jnp.zeros_like(acc_ref)

    acc_ref[...] += jnp.dot(x_ref[...], w_refs[0][...],
                            preferred_element_type=jnp.float32)

    @pl.when(pl.program_id(0) == pl.num_programs(0) - 1)
    def _():
        y = acc_ref[...] + b_refs[0][...]
        # linear_i -> dropout(eval: identity) -> ReLU for every linear except
        # the last, which is followed by dropout -> softmax.
        for i in range(1, num_layers):
            y = jnp.maximum(y, 0.0)
            y = jnp.dot(y, w_refs[i][...],
                        preferred_element_type=jnp.float32) + b_refs[i][...]
        # Padded class columns get -1e30 so they carry ~0 probability.
        col = lax.broadcasted_iota(jnp.int32, y.shape, 1)
        y = jnp.where(col < n_classes, y, -1e30)
        y = y - jnp.max(y, axis=-1, keepdims=True)
        e = jnp.exp(y)
        o_ref[...] = (e / jnp.sum(e, axis=-1, keepdims=True)).astype(o_ref.dtype)


def dense_stack(x, weights, biases, n_classes, tile_f):
    """x: (Bp, F_pad) with Bp % 8 == 0 and F_pad % tile_f == 0.
    weights[0]: (F_pad, Npad); weights[i>0]: (Npad, Npad); biases[i]: (1, Npad)."""
    Bp, F_pad = x.shape
    L = len(weights)
    Npad = weights[0].shape[1]

    in_specs = [pl.BlockSpec((Bp, tile_f), lambda k: (0, k)),
                pl.BlockSpec((tile_f, Npad), lambda k: (k, 0)),
                pl.BlockSpec((1, Npad), lambda k: (0, 0))]
    args = [x, weights[0], biases[0]]
    for w, b in zip(weights[1:], biases[1:]):
        in_specs.append(pl.BlockSpec((Npad, Npad), lambda k: (0, 0)))
        in_specs.append(pl.BlockSpec((1, Npad), lambda k: (0, 0)))
        args += [w, b]

    return pl.pallas_call(
        functools.partial(_dense_stack_kernel, L, n_classes),
        out_shape=jax.ShapeDtypeStruct((Bp, Npad), jnp.float32),
        grid=(F_pad // tile_f,),
        in_specs=in_specs,
        out_specs=pl.BlockSpec((Bp, Npad), lambda k: (0, 0)),
        scratch_shapes=[pltpu.VMEM((Bp, Npad), jnp.float32)],
        compiler_params=pltpu.CompilerParams(
            dimension_semantics=("arbitrary",),
            vmem_limit_bytes=32 * 1024 * 1024),
    )(*args)


# ---------------------------------------------------------------------------
# MgcNet (Pallas version, eval-mode semantics)
# ---------------------------------------------------------------------------

class MgcNetPallas:
    BLOCK_F = 8192   # reduction tile for the first dense layer

    def __init__(self, out_channels, num_conv_layers, num_dense_layers,
                 n_classes, kernel=3, img_size=128, key=None):
        assert kernel == 3, "reference module is used with kernel=3 (padding=1)"
        if key is None:
            key = jax.random.PRNGKey(0)
        self.out_channels = out_channels
        self.num_conv_layers = num_conv_layers
        self.num_dense_layers = num_dense_layers
        self.n_classes = n_classes
        self.img_size = img_size

        # BatchNorm2d(num_features=1) in eval mode with default running stats
        # (mean=0, var=1, gamma=1, beta=0) is the scalar affine x / sqrt(1+eps);
        # fold it and the conv bias into the conv weights.
        eps = 1e-5
        bn_scale = 1.0 / float(np.sqrt(1.0 + eps))

        self.conv_w, self.conv_b = [], []
        key, sub = jax.random.split(key)
        w, b = self._init_conv(sub, 1, out_channels)
        self.conv_w.append((w * bn_scale).reshape(-1))       # (Cout*Cin*9,)
        self.conv_b.append(b * bn_scale)

        self.pool_strides = []
        successive_poolings = 0
        for _ in range(num_conv_layers - 1):
            key, sub = jax.random.split(key)
            w, b = self._init_conv(sub, out_channels, out_channels)
            self.conv_w.append((w * bn_scale).reshape(-1))
            self.conv_b.append(b * bn_scale)
            if img_size // 2 ** successive_poolings > 32:
                self.pool_strides.append(2)
                successive_poolings += 1
            else:
                self.pool_strides.append(1)
        self.successive_poolings = successive_poolings
        pooled = img_size // 2 ** successive_poolings
        self.in_features = out_channels * pooled * pooled

        # Dense stack padded for full-lane / full-sublane tiles: classes padded
        # to a 128 multiple, in_features padded to the reduction tile (zeros,
        # so results are exact; padded logits are masked before the softmax).
        self.n_pad = _round_up(n_classes, 128)
        f128 = _round_up(max(self.in_features, 1), 128)
        self.tile_f = f128 if f128 <= self.BLOCK_F else self.BLOCK_F
        self.f_pad = _round_up(max(self.in_features, 1), self.tile_f)

        self.dense_w, self.dense_b = [], []
        prev, prev_pad = self.in_features, self.f_pad
        for _ in range(num_dense_layers):
            key, sub = jax.random.split(key)
            w, b = self._init_linear(sub, prev, n_classes)
            self.dense_w.append(jnp.pad(
                w, ((0, prev_pad - prev), (0, self.n_pad - n_classes))))
            self.dense_b.append(jnp.pad(
                b.reshape(1, -1), ((0, 0), (0, self.n_pad - n_classes))))
            prev, prev_pad = n_classes, self.n_pad

    @staticmethod
    def _init_conv(key, cin, cout, k=3):
        wk, bk = jax.random.split(key)
        bound = 1.0 / np.sqrt(cin * k * k)
        # torch OIHW layout (Cout, Cin, KH, KW); flattened C-order in-kernel.
        w = jax.random.uniform(wk, (cout, cin, k, k), jnp.float32, -bound, bound)
        b = jax.random.uniform(bk, (cout,), jnp.float32, -bound, bound)
        return w, b

    @staticmethod
    def _init_linear(key, fin, fout):
        wk, bk = jax.random.split(key)
        bound = 1.0 / np.sqrt(fin)
        w = jax.random.uniform(wk, (fin, fout), jnp.float32, -bound, bound)
        b = jax.random.uniform(bk, (fout,), jnp.float32, -bound, bound)
        return w, b

    def forward(self, x_nchw):
        """x_nchw: (B, 1, img_size, img_size) — same convention as PyTorch."""
        x = x_nchw.astype(jnp.float32)

        # conv_input -> BN -> ReLU  (no pooling after the input conv)
        x = conv_bn_relu_pool(x, self.conv_w[0], self.conv_b[0], pool_stride=0)

        # (conv_i -> BN -> ReLU -> maxpool_i) * (num_conv_layers - 1)
        for i in range(self.num_conv_layers - 1):
            x = conv_bn_relu_pool(x, self.conv_w[i + 1], self.conv_b[i + 1],
                                  pool_stride=self.pool_strides[i])

        # NCHW flatten == torch `.view(-1, C*P*P)`: free reshape, no transpose.
        B = x.shape[0]
        x = x.reshape(B, -1)
        if self.num_dense_layers == 0:
            return x

        # Pad batch to a sublane multiple of 8 and features to the tile size.
        bp = _round_up(max(B, 1), 8)
        x = jnp.pad(x, ((0, bp - B), (0, self.f_pad - self.in_features)))
        probs = dense_stack(x, self.dense_w, self.dense_b,
                            self.n_classes, self.tile_f)
        return probs[:B, :self.n_classes]


# ---------------------------------------------------------------------------
# Demo
# ---------------------------------------------------------------------------

if __name__ == "__main__":
    # img_size=64 with 3 conv layers exercises both the stride-2 and stride-1
    # pooling paths; out_channels=8 exercises the output-channel grid blocking;
    # batch=2 exercises the batch/class padding in the fused dense stack.
    model = MgcNetPallas(out_channels=8, num_conv_layers=3, num_dense_layers=2,
                         n_classes=5, kernel=3, img_size=64,
                         key=jax.random.PRNGKey(0))

    x = jax.random.normal(jax.random.PRNGKey(0), (2, 1, 64, 64), jnp.float32)

    out = jax.block_until_ready(model.forward(x))

    assert out.shape == (2, 5), out.shape
    row_sums = np.asarray(jnp.sum(out, axis=1))
    assert np.allclose(row_sums, 1.0, atol=1e-4), row_sums
    assert np.all(np.asarray(out) >= 0.0)

    print("KERNEL_OK")
</pallas_src>

<mosaic_0001>
module attributes {stable_mosaic.version = 11 : i64} {
  func.func @_conv_fused_kernel(%arg0: i32, %arg1: i32, %arg2: memref<72xf32, #tpu.memory_space<smem>>, %arg3: memref<8xf32, #tpu.memory_space<smem>>, %arg4: memref<1x1x64x64xf32, #tpu.memory_space<vmem>>, %arg5: memref<1x2x64x64xf32, #tpu.memory_space<vmem>>) attributes {dimension_semantics = [#tpu.dimension_semantics<parallel>, #tpu.dimension_semantics<parallel>], iteration_bounds = array<i64: 2, 4>, scalar_prefetch = 2 : i64, scratch_operands = 0 : i64, tpu.core_type = #tpu.core_type<tc>, window_params = [{transform_indices = @transform_0, window_bounds = array<i64: 1, 1, 64, 64>}, {transform_indices = @transform_1, window_bounds = array<i64: 1, 2, 64, 64>}]} {
    %c2_i32 = arith.constant 2 : i32
    %0 = arith.muli %arg1, %c2_i32 : i32
    %1 = tpu.iota {dimensions = array<i32: 0>} : vector<64x64xi32>
    %2 = tpu.iota {dimensions = array<i32: 1>} : vector<64x64xi32>
    %cst = arith.constant 0.000000e+00 : f32
    %3 = vector.broadcast %cst : f32 to vector<64x64xf32>
    %cst_0 = arith.constant 0.000000e+00 : f32
    %4 = vector.broadcast %cst_0 : f32 to vector<64x64xf32>
    %c0 = arith.constant 0 : index
    %c0_1 = arith.constant 0 : index
    %c0_2 = arith.constant 0 : index
    %c0_3 = arith.constant 0 : index
    %5 = vector.load %arg4[%c0, %c0_1, %c0_2, %c0_3] : memref<1x1x64x64xf32, #tpu.memory_space<vmem>>, vector<1x1x64x64xf32>
    %6 = vector.shape_cast %5 : vector<1x1x64x64xf32> to vector<64x64xf32>
    %c1_i32 = arith.constant 1 : i32
    %7 = tpu.dynamic_rotate %6 by %c1_i32 dim 0 : vector<64x64xf32>, i32 -> vector<64x64xf32>
    %c0_i32 = arith.constant 0 : i32
    %8 = vector.broadcast %c0_i32 : i32 to vector<64x64xi32>
    %9 = arith.cmpi eq, %1, %8 : vector<64x64xi32>
    %cst_4 = arith.constant 0.000000e+00 : f32
    %10 = vector.broadcast %cst_4 : f32 to vector<64x64xf32>
    %11 = arith.select %9, %10, %7 : vector<64x64xi1>, vector<64x64xf32>
    %c1_i32_5 = arith.constant 1 : i32
    %12 = tpu.dynamic_rotate %11 by %c1_i32_5 dim 1 : vector<64x64xf32>, i32 -> vector<64x64xf32>
    %c0_i32_6 = arith.constant 0 : i32
    %13 = vector.broadcast %c0_i32_6 : i32 to vector<64x64xi32>
    %14 = arith.cmpi eq, %2, %13 : vector<64x64xi32>
    %cst_7 = arith.constant 0.000000e+00 : f32
    %15 = vector.broadcast %cst_7 : f32 to vector<64x64xf32>
    %16 = arith.select %14, %15, %12 : vector<64x64xi1>, vector<64x64xf32>
    %c0_i32_8 = arith.constant 0 : i32
    %17 = arith.addi %0, %c0_i32_8 : i32
    %c1_i32_9 = arith.constant 1 : i32
    %18 = arith.muli %17, %c1_i32_9 : i32
    %c0_i32_10 = arith.constant 0 : i32
    %19 = arith.addi %18, %c0_i32_10 : i32
    %c9_i32 = arith.constant 9 : i32
    %20 = arith.muli %19, %c9_i32 : i32
    %c0_i32_11 = arith.constant 0 : i32
    %21 = arith.addi %20, %c0_i32_11 : i32
    %c0_i32_12 = arith.constant 0 : i32
    %22 = arith.addi %21, %c0_i32_12 : i32
    %23 = arith.index_cast %22 : i32 to index
    %24 = memref.load %arg2[%23] : memref<72xf32, #tpu.memory_space<smem>>
    %25 = vector.broadcast %24 : f32 to vector<64x64xf32>
    %26 = arith.mulf %16, %25 : vector<64x64xf32>
    %27 = arith.addf %3, %26 : vector<64x64xf32>
    %c1_i32_13 = arith.constant 1 : i32
    %28 = arith.addi %0, %c1_i32_13 : i32
    %c1_i32_14 = arith.constant 1 : i32
    %29 = arith.muli %28, %c1_i32_14 : i32
    %c0_i32_15 = arith.constant 0 : i32
    %30 = arith.addi %29, %c0_i32_15 : i32
    %c9_i32_16 = arith.constant 9 : i32
    %31 = arith.muli %30, %c9_i32_16 : i32
    %c0_i32_17 = arith.constant 0 : i32
    %32 = arith.addi %31, %c0_i32_17 : i32
    %c0_i32_18 = arith.constant 0 : i32
    %33 = arith.addi %32, %c0_i32_18 : i32
    %34 = arith.index_cast %33 : i32 to index
    %35 = memref.load %arg2[%34] : memref<72xf32, #tpu.memory_space<smem>>
    %36 = vector.broadcast %35 : f32 to vector<64x64xf32>
    %37 = arith.mulf %16, %36 : vector<64x64xf32>
    %38 = arith.addf %4, %37 : vector<64x64xf32>
    %c0_i32_19 = arith.constant 0 : i32
    %39 = arith.addi %0, %c0_i32_19 : i32
    %c1_i32_20 = arith.constant 1 : i32
    %40 = arith.muli %39, %c1_i32_20 : i32
    %c0_i32_21 = arith.constant 0 : i32
    %41 = arith.addi %40, %c0_i32_21 : i32
    %c9_i32_22 = arith.constant 9 : i32
    %42 = arith.muli %41, %c9_i32_22 : i32
    %c0_i32_23 = arith.constant 0 : i32
    %43 = arith.addi %42, %c0_i32_23 : i32
    %c1_i32_24 = arith.constant 1 : i32
    %44 = arith.addi %43, %c1_i32_24 : i32
    %45 = arith.index_cast %44 : i32 to index
    %46 = memref.load %arg2[%45] : memref<72xf32, #tpu.memory_space<smem>>
    %47 = vector.broadcast %46 : f32 to vector<64x64xf32>
    %48 = arith.mulf %11, %47 : vector<64x64xf32>
    %49 = arith.addf %27, %48 : vector<64x64xf32>
    %c1_i32_25 = arith.constant 1 : i32
    %50 = arith.addi %0, %c1_i32_25 : i32
    %c1_i32_26 = arith.constant 1 : i32
    %51 = arith.muli %50, %c1_i32_26 : i32
    %c0_i32_27 = arith.constant 0 : i32
    %52 = arith.addi %51, %c0_i32_27 : i32
    %c9_i32_28 = arith.constant 9 : i32
    %53 = arith.muli %52, %c9_i32_28 : i32
    %c0_i32_29 = arith.constant 0 : i32
    %54 = arith.addi %53, %c0_i32_29 : i32
    %c1_i32_30 = arith.constant 1 : i32
    %55 = arith.addi %54, %c1_i32_30 : i32
    %56 = arith.index_cast %55 : i32 to index
    %57 = memref.load %arg2[%56] : memref<72xf32, #tpu.memory_space<smem>>
    %58 = vector.broadcast %57 : f32 to vector<64x64xf32>
    %59 = arith.mulf %11, %58 : vector<64x64xf32>
    %60 = arith.addf %38, %59 : vector<64x64xf32>
    %c63_i32 = arith.constant 63 : i32
    %61 = tpu.dynamic_rotate %11 by %c63_i32 dim 1 : vector<64x64xf32>, i32 -> vector<64x64xf32>
    %c63_i32_31 = arith.constant 63 : i32
    %62 = vector.broadcast %c63_i32_31 : i32 to vector<64x64xi32>
    %63 = arith.cmpi eq, %2, %62 : vector<64x64xi32>
    %cst_32 = arith.constant 0.000000e+00 : f32
    %64 = vector.broadcast %cst_32 : f32 to vector<64x64xf32>
    %65 = arith.select %63, %64, %61 : vector<64x64xi1>, vector<64x64xf32>
    %c0_i32_33 = arith.constant 0 : i32
    %66 = arith.addi %0, %c0_i32_33 : i32
    %c1_i32_34 = arith.constant 1 : i32
    %67 = arith.muli %66, %c1_i32_34 : i32
    %c0_i32_35 = arith.constant 0 : i32
    %68 = arith.addi %67, %c0_i32_35 : i32
    %c9_i32_36 = arith.constant 9 : i32
    %69 = arith.muli %68, %c9_i32_36 : i32
    %c0_i32_37 = arith.constant 0 : i32
    %70 = arith.addi %69, %c0_i32_37 : i32
    %c2_i32_38 = arith.constant 2 : i32
    %71 = arith.addi %70, %c2_i32_38 : i32
    %72 = arith.index_cast %71 : i32 to index
    %73 = memref.load %arg2[%72] : memref<72xf32, #tpu.memory_space<smem>>
    %74 = vector.broadcast %73 : f32 to vector<64x64xf32>
    %75 = arith.mulf %65, %74 : vector<64x64xf32>
    %76 = arith.addf %49, %75 : vector<64x64xf32>
    %c1_i32_39 = arith.constant 1 : i32
    %77 = arith.addi %0, %c1_i32_39 : i32
    %c1_i32_40 = arith.constant 1 : i32
    %78 = arith.muli %77, %c1_i32_40 : i32
    %c0_i32_41 = arith.constant 0 : i32
    %79 = arith.addi %78, %c0_i32_41 : i32
    %c9_i32_42 = arith.constant 9 : i32
    %80 = arith.muli %79, %c9_i32_42 : i32
    %c0_i32_43 = arith.constant 0 : i32
    %81 = arith.addi %80, %c0_i32_43 : i32
    %c2_i32_44 = arith.constant 2 : i32
    %82 = arith.addi %81, %c2_i32_44 : i32
    %83 = arith.index_cast %82 : i32 to index
    %84 = memref.load %arg2[%83] : memref<72xf32, #tpu.memory_space<smem>>
    %85 = vector.broadcast %84 : f32 to vector<64x64xf32>
    %86 = arith.mulf %65, %85 : vector<64x64xf32>
    %87 = arith.addf %60, %86 : vector<64x64xf32>
    %c1_i32_45 = arith.constant 1 : i32
    %88 = tpu.dynamic_rotate %6 by %c1_i32_45 dim 1 : vector<64x64xf32>, i32 -> vector<64x64xf32>
    %c0_i32_46 = arith.constant 0 : i32
    %89 = vector.broadcast %c0_i32_46 : i32 to vector<64x64xi32>
    %90 = arith.cmpi eq, %2, %89 : vector<64x64xi32>
    %cst_47 = arith.constant 0.000000e+00 : f32
    %91 = vector.broadcast %cst_47 : f32 to vector<64x64xf32>
    %92 = arith.select %90, %91, %88 : vector<64x64xi1>, vector<64x64xf32>
    %c0_i32_48 = arith.constant 0 : i32
    %93 = arith.addi %0, %c0_i32_48 : i32
    %c1_i32_49 = arith.constant 1 : i32
    %94 = arith.muli %93, %c1_i32_49 : i32
    %c0_i32_50 = arith.constant 0 : i32
    %95 = arith.addi %94, %c0_i32_50 : i32
    %c9_i32_51 = arith.constant 9 : i32
    %96 = arith.muli %95, %c9_i32_51 : i32
    %c3_i32 = arith.constant 3 : i32
    %97 = arith.addi %96, %c3_i32 : i32
    %c0_i32_52 = arith.constant 0 : i32
    %98 = arith.addi %97, %c0_i32_52 : i32
    %99 = arith.index_cast %98 : i32 to index
    %100 = memref.load %arg2[%99] : memref<72xf32, #tpu.memory_space<smem>>
    %101 = vector.broadcast %100 : f32 to vector<64x64xf32>
    %102 = arith.mulf %92, %101 : vector<64x64xf32>
    %103 = arith.addf %76, %102 : vector<64x64xf32>
    %c1_i32_53 = arith.constant 1 : i32
    %104 = arith.addi %0, %c1_i32_53 : i32
    %c1_i32_54 = arith.constant 1 : i32
    %105 = arith.muli %104, %c1_i32_54 : i32
    %c0_i32_55 = arith.constant 0 : i32
    %106 = arith.addi %105, %c0_i32_55 : i32
    %c9_i32_56 = arith.constant 9 : i32
    %107 = arith.muli %106, %c9_i32_56 : i32
    %c3_i32_57 = arith.constant 3 : i32
    %108 = arith.addi %107, %c3_i32_57 : i32
    %c0_i32_58 = arith.constant 0 : i32
    %109 = arith.addi %108, %c0_i32_58 : i32
    %110 = arith.index_cast %109 : i32 to index
    %111 = memref.load %arg2[%110] : memref<72xf32, #tpu.memory_space<smem>>
    %112 = vector.broadcast %111 : f32 to vector<64x64xf32>
    %113 = arith.mulf %92, %112 : vector<64x64xf32>
    %114 = arith.addf %87, %113 : vector<64x64xf32>
    %c0_i32_59 = arith.constant 0 : i32
    %115 = arith.addi %0, %c0_i32_59 : i32
    %c1_i32_60 = arith.constant 1 : i32
    %116 = arith.muli %115, %c1_i32_60 : i32
    %c0_i32_61 = arith.constant 0 : i32
    %117 = arith.addi %116, %c0_i32_61 : i32
    %c9_i32_62 = arith.constant 9 : i32
    %118 = arith.muli %117, %c9_i32_62 : i32
    %c3_i32_63 = arith.constant 3 : i32
    %119 = arith.addi %118, %c3_i32_63 : i32
    %c1_i32_64 = arith.constant 1 : i32
    %120 = arith.addi %119, %c1_i32_64 : i32
    %121 = arith.index_cast %120 : i32 to index
    %122 = memref.load %arg2[%121] : memref<72xf32, #tpu.memory_space<smem>>
    %123 = vector.broadcast %122 : f32 to vector<64x64xf32>
    %124 = arith.mulf %6, %123 : vector<64x64xf32>
    %125 = arith.addf %103, %124 : vector<64x64xf32>
    %c1_i32_65 = arith.constant 1 : i32
    %126 = arith.addi %0, %c1_i32_65 : i32
    %c1_i32_66 = arith.constant 1 : i32
    %127 = arith.muli %126, %c1_i32_66 : i32
    %c0_i32_67 = arith.constant 0 : i32
    %128 = arith.addi %127, %c0_i32_67 : i32
    %c9_i32_68 = arith.constant 9 : i32
    %129 = arith.muli %128, %c9_i32_68 : i32
    %c3_i32_69 = arith.constant 3 : i32
    %130 = arith.addi %129, %c3_i32_69 : i32
    %c1_i32_70 = arith.constant 1 : i32
    %131 = arith.addi %130, %c1_i32_70 : i32
    %132 = arith.index_cast %131 : i32 to index
    %133 = memref.load %arg2[%132] : memref<72xf32, #tpu.memory_space<smem>>
    %134 = vector.broadcast %133 : f32 to vector<64x64xf32>
    %135 = arith.mulf %6, %134 : vector<64x64xf32>
    %136 = arith.addf %114, %135 : vector<64x64xf32>
    %c63_i32_71 = arith.constant 63 : i32
    %137 = tpu.dynamic_rotate %6 by %c63_i32_71 dim 1 : vector<64x64xf32>, i32 -> vector<64x64xf32>
    %c63_i32_72 = arith.constant 63 : i32
    %138 = vector.broadcast %c63_i32_72 : i32 to vector<64x64xi32>
    %139 = arith.cmpi eq, %2, %138 : vector<64x64xi32>
    %cst_73 = arith.constant 0.000000e+00 : f32
    %140 = vector.broadcast %cst_73 : f32 to vector<64x64xf32>
    %141 = arith.select %139, %140, %137 : vector<64x64xi1>, vector<64x64xf32>
    %c0_i32_74 = arith.constant 0 : i32
    %142 = arith.addi %0, %c0_i32_74 : i32
    %c1_i32_75 = arith.constant 1 : i32
    %143 = arith.muli %142, %c1_i32_75 : i32
    %c0_i32_76 = arith.constant 0 : i32
    %144 = arith.addi %143, %c0_i32_76 : i32
    %c9_i32_77 = arith.constant 9 : i32
    %145 = arith.muli %144, %c9_i32_77 : i32
    %c3_i32_78 = arith.constant 3 : i32
    %146 = arith.addi %145, %c3_i32_78 : i32
    %c2_i32_79 = arith.constant 2 : i32
    %147 = arith.addi %146, %c2_i32_79 : i32
    %148 = arith.index_cast %147 : i32 to index
    %149 = memref.load %arg2[%148] : memref<72xf32, #tpu.memory_space<smem>>
    %150 = vector.broadcast %149 : f32 to vector<64x64xf32>
    %151 = arith.mulf %141, %150 : vector<64x64xf32>
    %152 = arith.addf %125, %151 : vector<64x64xf32>
    %c1_i32_80 = arith.constant 1 : i32
    %153 = arith.addi %0, %c1_i32_80 : i32
    %c1_i32_81 = arith.constant 1 : i32
    %154 = arith.muli %153, %c1_i32_81 : i32
    %c0_i32_82 = arith.constant 0 : i32
    %155 = arith.addi %154, %c0_i32_82 : i32
    %c9_i32_83 = arith.constant 9 : i32
    %156 = arith.muli %155, %c9_i32_83 : i32
    %c3_i32_84 = arith.constant 3 : i32
    %157 = arith.addi %156, %c3_i32_84 : i32
    %c2_i32_85 = arith.constant 2 : i32
    %158 = arith.addi %157, %c2_i32_85 : i32
    %159 = arith.index_cast %158 : i32 to index
    %160 = memref.load %arg2[%159] : memref<72xf32, #tpu.memory_space<smem>>
    %161 = vector.broadcast %160 : f32 to vector<64x64xf32>
    %162 = arith.mulf %141, %161 : vector<64x64xf32>
    %163 = arith.addf %136, %162 : vector<64x64xf32>
    %c63_i32_86 = arith.constant 63 : i32
    %164 = tpu.dynamic_rotate %6 by %c63_i32_86 dim 0 : vector<64x64xf32>, i32 -> vector<64x64xf32>
    %c63_i32_87 = arith.constant 63 : i32
    %165 = vector.broadcast %c63_i32_87 : i32 to vector<64x64xi32>
    %166 = arith.cmpi eq, %1, %165 : vector<64x64xi32>
    %cst_88 = arith.constant 0.000000e+00 : f32
    %167 = vector.broadcast %cst_88 : f32 to vector<64x64xf32>
    %168 = arith.select %166, %167, %164 : vector<64x64xi1>, vector<64x64xf32>
    %c1_i32_89 = arith.constant 1 : i32
    %169 = tpu.dynamic_rotate %168 by %c1_i32_89 dim 1 : vector<64x64xf32>, i32 -> vector<64x64xf32>
    %c0_i32_90 = arith.constant 0 : i32
    %170 = vector.broadcast %c0_i32_90 : i32 to vector<64x64xi32>
    %171 = arith.cmpi eq, %2, %170 : vector<64x64xi32>
    %cst_91 = arith.constant 0.000000e+00 : f32
    %172 = vector.broadcast %cst_91 : f32 to vector<64x64xf32>
    %173 = arith.select %171, %172, %169 : vector<64x64xi1>, vector<64x64xf32>
    %c0_i32_92 = arith.constant 0 : i32
    %174 = arith.addi %0, %c0_i32_92 : i32
    %c1_i32_93 = arith.constant 1 : i32
    %175 = arith.muli %174, %c1_i32_93 : i32
    %c0_i32_94 = arith.constant 0 : i32
    %176 = arith.addi %175, %c0_i32_94 : i32
    %c9_i32_95 = arith.constant 9 : i32
    %177 = arith.muli %176, %c9_i32_95 : i32
    %c6_i32 = arith.constant 6 : i32
    %178 = arith.addi %177, %c6_i32 : i32
    %c0_i32_96 = arith.constant 0 : i32
    %179 = arith.addi %178, %c0_i32_96 : i32
    %180 = arith.index_cast %179 : i32 to index
    %181 = memref.load %arg2[%180] : memref<72xf32, #tpu.memory_space<smem>>
    %182 = vector.broadcast %181 : f32 to vector<64x64xf32>
    %183 = arith.mulf %173, %182 : vector<64x64xf32>
    %184 = arith.addf %152, %183 : vector<64x64xf32>
    %c1_i32_97 = arith.constant 1 : i32
    %185 = arith.addi %0, %c1_i32_97 : i32
    %c1_i32_98 = arith.constant 1 : i32
    %186 = arith.muli %185, %c1_i32_98 : i32
    %c0_i32_99 = arith.constant 0 : i32
    %187 = arith.addi %186, %c0_i32_99 : i32
    %c9_i32_100 = arith.constant 9 : i32
    %188 = arith.muli %187, %c9_i32_100 : i32
    %c6_i32_101 = arith.constant 6 : i32
    %189 = arith.addi %188, %c6_i32_101 : i32
    %c0_i32_102 = arith.constant 0 : i32
    %190 = arith.addi %189, %c0_i32_102 : i32
    %191 = arith.index_cast %190 : i32 to index
    %192 = memref.load %arg2[%191] : memref<72xf32, #tpu.memory_space<smem>>
    %193 = vector.broadcast %192 : f32 to vector<64x64xf32>
    %194 = arith.mulf %173, %193 : vector<64x64xf32>
    %195 = arith.addf %163, %194 : vector<64x64xf32>
    %c0_i32_103 = arith.constant 0 : i32
    %196 = arith.addi %0, %c0_i32_103 : i32
    %c1_i32_104 = arith.constant 1 : i32
    %197 = arith.muli %196, %c1_i32_104 : i32
    %c0_i32_105 = arith.constant 0 : i32
    %198 = arith.addi %197, %c0_i32_105 : i32
    %c9_i32_106 = arith.constant 9 : i32
    %199 = arith.muli %198, %c9_i32_106 : i32
    %c6_i32_107 = arith.constant 6 : i32
    %200 = arith.addi %199, %c6_i32_107 : i32
    %c1_i32_108 = arith.constant 1 : i32
    %201 = arith.addi %200, %c1_i32_108 : i32
    %202 = arith.index_cast %201 : i32 to index
    %203 = memref.load %arg2[%202] : memref<72xf32, #tpu.memory_space<smem>>
    %204 = vector.broadcast %203 : f32 to vector<64x64xf32>
    %205 = arith.mulf %168, %204 : vector<64x64xf32>
    %206 = arith.addf %184, %205 : vector<64x64xf32>
    %c1_i32_109 = arith.constant 1 : i32
    %207 = arith.addi %0, %c1_i32_109 : i32
    %c1_i32_110 = arith.constant 1 : i32
    %208 = arith.muli %207, %c1_i32_110 : i32
    %c0_i32_111 = arith.constant 0 : i32
    %209 = arith.addi %208, %c0_i32_111 : i32
    %c9_i32_112 = arith.constant 9 : i32
    %210 = arith.muli %209, %c9_i32_112 : i32
    %c6_i32_113 = arith.constant 6 : i32
    %211 = arith.addi %210, %c6_i32_113 : i32
    %c1_i32_114 = arith.constant 1 : i32
    %212 = arith.addi %211, %c1_i32_114 : i32
    %213 = arith.index_cast %212 : i32 to index
    %214 = memref.load %arg2[%213] : memref<72xf32, #tpu.memory_space<smem>>
    %215 = vector.broadcast %214 : f32 to vector<64x64xf32>
    %216 = arith.mulf %168, %215 : vector<64x64xf32>
    %217 = arith.addf %195, %216 : vector<64x64xf32>
    %c63_i32_115 = arith.constant 63 : i32
    %218 = tpu.dynamic_rotate %168 by %c63_i32_115 dim 1 : vector<64x64xf32>, i32 -> vector<64x64xf32>
    %c63_i32_116 = arith.constant 63 : i32
    %219 = vector.broadcast %c63_i32_116 : i32 to vector<64x64xi32>
    %220 = arith.cmpi eq, %2, %219 : vector<64x64xi32>
    %cst_117 = arith.constant 0.000000e+00 : f32
    %221 = vector.broadcast %cst_117 : f32 to vector<64x64xf32>
    %222 = arith.select %220, %221, %218 : vector<64x64xi1>, vector<64x64xf32>
    %c0_i32_118 = arith.constant 0 : i32
    %223 = arith.addi %0, %c0_i32_118 : i32
    %c1_i32_119 = arith.constant 1 : i32
    %224 = arith.muli %223, %c1_i32_119 : i32
    %c0_i32_120 = arith.constant 0 : i32
    %225 = arith.addi %224, %c0_i32_120 : i32
    %c9_i32_121 = arith.constant 9 : i32
    %226 = arith.muli %225, %c9_i32_121 : i32
    %c6_i32_122 = arith.constant 6 : i32
    %227 = arith.addi %226, %c6_i32_122 : i32
    %c2_i32_123 = arith.constant 2 : i32
    %228 = arith.addi %227, %c2_i32_123 : i32
    %229 = arith.index_cast %228 : i32 to index
    %230 = memref.load %arg2[%229] : memref<72xf32, #tpu.memory_space<smem>>
    %231 = vector.broadcast %230 : f32 to vector<64x64xf32>
    %232 = arith.mulf %222, %231 : vector<64x64xf32>
    %233 = arith.addf %206, %232 : vector<64x64xf32>
    %c1_i32_124 = arith.constant 1 : i32
    %234 = arith.addi %0, %c1_i32_124 : i32
    %c1_i32_125 = arith.constant 1 : i32
    %235 = arith.muli %234, %c1_i32_125 : i32
    %c0_i32_126 = arith.constant 0 : i32
    %236 = arith.addi %235, %c0_i32_126 : i32
    %c9_i32_127 = arith.constant 9 : i32
    %237 = arith.muli %236, %c9_i32_127 : i32
    %c6_i32_128 = arith.constant 6 : i32
    %238 = arith.addi %237, %c6_i32_128 : i32
    %c2_i32_129 = arith.constant 2 : i32
    %239 = arith.addi %238, %c2_i32_129 : i32
    %240 = arith.index_cast %239 : i32 to index
    %241 = memref.load %arg2[%240] : memref<72xf32, #tpu.memory_space<smem>>
    %242 = vector.broadcast %241 : f32 to vector<64x64xf32>
    %243 = arith.mulf %222, %242 : vector<64x64xf32>
    %244 = arith.addf %217, %243 : vector<64x64xf32>
    %c0_i32_130 = arith.constant 0 : i32
    %245 = arith.addi %0, %c0_i32_130 : i32
    %246 = arith.index_cast %245 : i32 to index
    %247 = memref.load %arg3[%246] : memref<8xf32, #tpu.memory_space<smem>>
    %248 = vector.broadcast %247 : f32 to vector<64x64xf32>
    %249 = arith.addf %233, %248 : vector<64x64xf32>
    %cst_131 = arith.constant 0.000000e+00 : f32
    %250 = vector.broadcast %cst_131 : f32 to vector<64x64xf32>
    %251 = arith.maximumf %249, %250 : vector<64x64xf32>
    %c0_132 = arith.constant 0 : index
    %c0_133 = arith.constant 0 : index
    %c0_134 = arith.constant 0 : index
    %c0_135 = arith.constant 0 : index
    %252 = vector.load %arg5[%c0_132, %c0_133, %c0_134, %c0_135] : memref<1x2x64x64xf32, #tpu.memory_space<vmem>>, vector<1x1x64x64xf32>
    %253 = vector.shape_cast %252 : vector<1x1x64x64xf32> to vector<64x64xf32>
    %254 = vector.shape_cast %251 : vector<64x64xf32> to vector<1x1x64x64xf32>
    tpu.vector_store %arg5[%c0_132, %c0_133, %c0_134, %c0_135], %254 {strides = array<i32>} : memref<1x2x64x64xf32, #tpu.memory_space<vmem>>, vector<1x1x64x64xf32>,
    %c1_i32_136 = arith.constant 1 : i32
    %255 = arith.addi %0, %c1_i32_136 : i32
    %256 = arith.index_cast %255 : i32 to index
    %257 = memref.load %arg3[%256] : memref<8xf32, #tpu.memory_space<smem>>
    %258 = vector.broadcast %257 : f32 to vector<64x64xf32>
    %259 = arith.addf %244, %258 : vector<64x64xf32>
    %cst_137 = arith.constant 0.000000e+00 : f32
    %260 = vector.broadcast %cst_137 : f32 to vector<64x64xf32>
    %261 = arith.maximumf %259, %260 : vector<64x64xf32>
    %c0_138 = arith.constant 0 : index
    %c1 = arith.constant 1 : index
    %c0_139 = arith.constant 0 : index
    %c0_140 = arith.constant 0 : index
    %262 = vector.load %arg5[%c0_138, %c1, %c0_139, %c0_140] : memref<1x2x64x64xf32, #tpu.memory_space<vmem>>, vector<1x1x64x64xf32>
    %263 = vector.shape_cast %262 : vector<1x1x64x64xf32> to vector<64x64xf32>
    %264 = vector.shape_cast %261 : vector<64x64xf32> to vector<1x1x64x64xf32>
    tpu.vector_store %arg5[%c0_138, %c1, %c0_139, %c0_140], %264 {strides = array<i32>} : memref<1x2x64x64xf32, #tpu.memory_space<vmem>>, vector<1x1x64x64xf32>,
    return
  }
  func.func @transform_0(%arg0: i32, %arg1: i32, %arg2: memref<72xf32, #tpu.memory_space<smem>>, %arg3: memref<8xf32, #tpu.memory_space<smem>>) -> (i32, i32, i32, i32) {
    %c0_i32 = arith.constant 0 : i32
    %c0_i32_0 = arith.constant 0 : i32
    %c0_i32_1 = arith.constant 0 : i32
    %c0_i32_2 = arith.constant 0 : i32
    return %arg0, %c0_i32, %c0_i32_0, %c0_i32_1 : i32, i32, i32, i32
  }
  func.func @transform_1(%arg0: i32, %arg1: i32, %arg2: memref<72xf32, #tpu.memory_space<smem>>, %arg3: memref<8xf32, #tpu.memory_space<smem>>) -> (i32, i32, i32, i32) {
    %c0_i32 = arith.constant 0 : i32
    %c0_i32_0 = arith.constant 0 : i32
    %c0_i32_1 = arith.constant 0 : i32
    return %arg0, %arg1, %c0_i32, %c0_i32_0 : i32, i32, i32, i32
  }
}

</mosaic_0001>

<bundles_post_ra>
// kernel: tpu_custom_call.1
= control target key start
LH: loop header
LB: loop body
LE: loop exit
PB: predicated region body
PF: predicated region fallthrough
CT: control target
= control target key end

     0   :  { %s1421_s12 = smov [#allocation3]   ;;  %s2748_s0 = inlined_call_operand.hbm [shape: f32[72], index: 0, kind: input, shape index: {}]   ;;  %s2749_s2 = inlined_call_operand.hbm [shape: f32[2,1,64,64], index: 2, kind: input, shape index: {}]   ;;  %s2750_s3 = inlined_call_operand.hbm [shape: f32[2,8,64,64], index: 3, kind: output, shape index: {}]   ;;  %s2751_s1 = inlined_call_operand.vmem [shape: f32[8], index: 1, kind: input, shape index: {}]  }
   0x1   :  { %2764 = sst [smem:[#allocation68_spill]] %s2749_s2  ;;  %s10_s17 = sshll.u32 %s2751_s1, 4  ;;  %s11_s17 = int_to_ptr.vmem [resolvable:$true] %s10_s17 }
   0x2   :  { %9 = dma.hbm_to_smem %s2748_s0, 16, %s1421_s12, [#allocation2] }
   0x3   :  { %s1257_s18 = scalar_lea.vmem %s11_s17, 16  ;;  %p1262_p1 = scmp.lt.s32.totalorder %s11_s17, %s11_s17 }
   0x4   :  { %p1258_p0 = scmp.ne.s32.totalorder %s11_s17, %s1257_s18  ;;  %p1263_p2 = scmp.lt.s32.totalorder %s1257_s18, %s1257_s18 }
   0x6   :  { %p1264_p3 = por %p1263_p2, %p1262_p1 }
   0x8   :  { %p1265_p4 = pnand %p1264_p3, %p1258_p0 }
   0xa   :  { %1268 = shalt.err (!%p1265_p4)  }
   0xb   :  { %s1422_s19 = smov [#allocation4]  }
   0xc   :  { %13 = dma.vmem_to_smem %s11_s17, 16, %s1422_s19, [#allocation2] }
   0xd   :  { %1367 = dma.done.wait [#allocation2], 32 }
   0xe   :  { %1368 = vsyncadd [#allocation2], 4294967264 }
   0xf   :  { %15 = sfence }
  0x10   :  { %16 = vsyncpa [#allocation6], 0 }
  0x11   :  { %18 = vsyncpa [#allocation6 + $0x1], 0 }
  0x12   :  { %19 = vsyncpa [#allocation7], 0 }
  0x13   :  { %21 = vsyncpa [#allocation7 + $0x1], 0  ;;  %s1458_s0 = smov 0   ;;  %s1460_s1 = smov 0  }
  0x14   :  { %s1462_s20 = smov 0   ;;  %s1464_s21 = smov 0  }
  0x15   :  { %s1466_s22 = smov 0   ;;  %s1468_s23 = smov 0  }
  0x16   :  { %s1470_s24 = smov 0   ;;  %s1472_s25 = smov 0  }
  0x17   :  { %s1474_s26 = smov 0   ;;  %s1476_s27 = smov 0  }
  0x18   :  { %s1478_s28 = smov 0  }
  0x19 LB: > { %2765 = sst [smem:[#allocation12_spill]] %s1395_s22  ;;  %s1110_s29 = sadd.s32 4294967295, %s1419_s28   ;;  %s1419_s28 = sphi %s1478_s28, %s27_s28   ;;  %s1415_s27 = sphi %s1476_s27, %s2883_s27   ;;  %s1411_s26 = sphi %s1474_s26, %s2882_s26   ;;  %s1407_s25 = sphi %s1472_s25, %s2881_s25   ;;  %s1403_s24 = sphi %s1470_s24, %s2880_s24   ;;  %s1399_s23 = sphi %s1468_s23, %s2879_s23   ;;  %s1395_s22 = sphi %s1466_s22, %s2878_s22   ;;  %s1391_s21 = sphi %s1464_s21, %s2877_s21   ;;  %s1387_s20 = sphi %s1462_s20, %s2886_s20   ;;  %s1383_s1 = sphi %s1460_s1, %s2885_s1   ;;  %s1379_s0 = sphi %s1458_s0, %s2884_s0  }
  0x1a   : > { %2766 = sst [smem:[#allocation13_spill]] %s1399_s23  ;;  %s1111_s30 = sadd.s32 4294967294, %s1419_s28  }
  0x1b   : > { %2767 = sst [smem:[#allocation14_spill]] %s1411_s26  ;;  %s36_s4 = sadd.s32 1, %s1411_s26 }
  0x1c   : > { %2768 = sst [smem:[#allocation15_spill]] %s1415_s27  ;;  %s39_s5 = sadd.s32 1, %s1415_s27 }
  0x1d   : > { %p37_p5 = scmp.ge.s32.totalorder %s36_s4, 4  ;;  %s46_s6 = sadd.s32 1, %s1399_s23 }
  0x1e   : > { %p53_p6 = scmp.ne.s32.totalorder %s1399_s23, %s1395_s22  ;;  %p54_p7 = scmp.eq.s32.totalorder %s1419_s28, 0 }
  0x1f   : > { %s2888_s4 = smov (%p37_p5, %s36_s4), 0  ;;  %s2890_s5 = smov (!%p37_p5, %s39_s5), %s1415_s27 }
  0x20   : > { %2769 = sst [smem:[#allocation16_spill]] %s2888_s4  ;;  %p1522_p8 = por %p54_p7, %p53_p6 }
  0x21   : > { %p59_p9 = scmp.ne.s32.totalorder %s1395_s22, %s1391_s21  ;;  %p41_p10 = scmp.ge.s32.totalorder %s2890_s5, 2 }
  0x22   : > { %p60_p11 = scmp.eq.s32.totalorder %s1110_s29, 0  ;;  %s70_s8 = ssub.s32 %s1411_s26, %s2888_s4 }
  0x23   : > { %s74_s9 = sadd.s32 1, %s1387_s20  ;;  %s2892_s5 = smov (%p41_p10, %s2890_s5), 0 }
  0x24   : > { %2771 = sst [smem:[#allocation17_spill]] %s2892_s5  ;;  %p1532_p12 = por %p60_p11, %p59_p9 }
  0x25   : > { %p84_p13 = scmp.ne.s32.totalorder %s1387_s20, %s1383_s1  ;;  %s43_s11 = ssub.s32 %s1415_s27, %s2892_s5 }
  0x26   : > { %p85_p0 = scmp.eq.s32.totalorder %s1110_s29, 7  ;;  %p44_p1 = scmp.eq.s32.totalorder %s43_s11, 0 }
  0x27   : > { %s71_s12 = sor.u32 %s70_s8, %s43_s11  ;;  %p90_p4 = scmp.ne.s32.totalorder %s1383_s1, %s1379_s0 }
  0x28   : > { %p72_p2 = scmp.eq.s32.totalorder %s71_s12, 0  ;;  %p1540_p3 = por %p85_p0, %p84_p13 }
  0x29   : > { %s1545_s14 = scalar_select %p44_p1, %s1399_s23, %s46_s6  }
  0x2a   : > { %s1548_s15 = scalar_select %p72_p2, %s1387_s20, %s74_s9  }
  0x2b   : > { %2774 = sst [smem:[#allocation18_spill]] %s1545_s14  ;;  %p91_p5 = scmp.eq.s32.totalorder %s1111_s30, 7 }
  0x2c   : > { %2775 = sst [smem:[#allocation19_spill]] %s1548_s15  ;;  %p1150_p6 = scmp.lt.s32.totalorder %s1419_s28, 8 }
  0x2d   : > { %p1553_p7 = por %p91_p5, %p90_p4  ;;  %s111_s17 = sand.u32 1, %s1399_s23  }
  0x2e   : > { %s1114_s18 = sshll.u32 %s111_s17, 6  ;;  %s1136_s19 = sshll.u32 %s1415_s27, 10 }
  0x2f   : > { %s2777_s2 = sld [smem:[#allocation68_spill]]  ;;  %s115_s11 = scalar_lea.vmem [#allocation5], %s1114_s18 }
  0x30   : > { %s122_s12 = sshll.u32 %s115_s11, 4  ;;  %p1564_p9 = pnand %p1150_p6, %p1522_p8  ;;  %s123_s12 = int_to_ptr.vmem [resolvable:$true] %s122_s12 }
  0x31   : > { %p1117_p10 = scmp.ge.s32.totalorder %s1419_s28, 1  ;;  %s112_s30 = scalar_lea.sflag [#allocation6], %s111_s17 }
  0x32   : > { %p1271_p11 = pneg %p1564_p9  ;;  %s1282_s9 = scalar_lea.vmem %s123_s12, 1024 }
  0x33   : > { %p1283_p13 = scmp.ne.s32.totalorder %s123_s12, %s1282_s9  ;;  %s1423_s5 = smov [#allocation5]  }
  0x34   : > { %s1287_s21 = sshll.u32 %s1423_s5, 4  ;;  %s1288_s21 = int_to_ptr.vmem [resolvable:$false] %s1287_s21 }
  0x35   : > { %s121_s8 = scalar_lea.hbm %s2777_s2, %s1136_s19  ;;  %p1285_p0 = pnand %p1283_p13, %p1271_p11 }
  0x36   : > { %s1289_s18 = scalar_lea.vmem %s1288_s21, 2048  ;;  %p1290_p2 = scmp.lt.s32.totalorder %s123_s12, %s1288_s21 }
  0x37   : > { %p1286_p1 = pneg %p1285_p0  ;;  %p1291_p4 = scmp.lt.s32.totalorder %s1289_s18, %s1282_s9 }
  0x39   : > { %p1292_p5 = por %p1291_p4, %p1290_p2 }
  0x3b   : > { %p1293_p8 = pnand %p1292_p5, %p1286_p1 }
  0x3d   : > { %1296 = shalt.err (!%p1293_p8)
}
  0x3e   : > { %s1424_s7 = smov 128   ;;  %s1425_s17 = smov 8  }
  0x3f   : > { %1145 = dma.hbm_to_vmem [thread:$0]  (!%p1564_p9), %s121_s8, 1024, %s123_s12, %s112_s30, %s1424_s7, %s1424_s7, %s1425_s17  }
  0x40   : > { %p130_p6 = scmp.lt.s32.totalorder %s1419_s28, 9 }
  0x42   : > { %p131_p11 = pnand %p1117_p10, %p130_p6 }
  0x44   : > { %134 = sbr.rel (%p131_p11) target bundleno = 567 (0x237), region = 24 }
  0x49   : > { %s136_s5 = sand.u32 1, %s1395_s22  }
  0x4a   : > { %s1118_s19 = sshll.u32 %s136_s5, 6  ;;  %s137_s29 = scalar_lea.sflag [#allocation6], %s136_s5 }
  0x4b   : > { %s140_s11 = scalar_lea.vmem [#allocation5], %s1118_s19 }
  0x4c   : > { %1370 = dma.done.wait (%p1532_p12), %s137_s29, 1024  }
  0x4d   : > { %1372 = vsyncadd (%p1532_p12), %s137_s29, 4294966272  ;;  %v161_v0 = vlaneseq  ;;  %v1584_v2 = vld [vmem:[%s140_s11 + $0x8] sm:$0xff]  ;;  %v1586_v3 = vld [vmem:[%s140_s11 + $0x10] sm:$0xff]  ;;  %s1426_s10 = smov 64   ;;  %vm213_vm4 = vcmask 1048064   ;;  %s1427_s8 = smov 65  }
  0x4e   : > { %v1589_v4 = vld [vmem:[%s140_s11] sm:$0xff]  ;;  %v181_v5 = vrot.slane %v1584_v2, 7  ;;  %v182_v6 = vrot.slane %v1586_v3, 7  ;;  %v1594_v8 = vld [vmem:[%s140_s11 + $0x18] sm:$0xff]  ;;  %v1600_v12 = vld [vmem:[%s140_s11 + $0x28] sm:$0xff]  ;;  %v686_v28 = vrot.slane %v1584_v2, 1 }
  0x4f   : > { %v1582_v1 = vshrl.u32 %v161_v0, 7  ;;  %v180_v7 = vrot.slane %v1589_v4, 7  ;;  %v1596_v9 = vld [vmem:[%s140_s11 + $0x20] sm:$0xff]  ;;  %v183_v10 = vrot.slane %v1594_v8, 7  ;;  %v1602_v13 = vld [vmem:[%s140_s11 + $0x30] sm:$0xff]  ;;  %v1612_v16 = vld [vmem:[%s140_s11 + $0x38] sm:$0xff] }
  0x50   : > { %v184_v11 = vrot.slane %v1596_v9, 7  ;;  %v185_v19 = vrot.slane %v1600_v12, 7  ;;  %v186_v20 = vrot.slane %v1602_v13, 7  ;;  %v187_v21 = vrot.slane %v1612_v16, 7  ;;  %s1428_s12 = smov 127   ;;  %s2753_s6 = sshll.u32 %s1403_s24, 1 }
  0x51   : > { %vm188_vm0 = vcmp.lt.s32.totalorder %v1582_v1, 1  ;;  %vm197_vm1 = vcmp.eq.s32.totalorder %v1582_v1, 0  ;;  %v685_v27 = vrot.slane %v1589_v4, 1  ;;  %vm693_vm2 = vcmp.lt.s32.totalorder %v1582_v1, 7  ;;  %s1906_s30 = sadd.s32 1, %s2753_s6  ;;  %s1909_s9 = smul.u32 18, %s1403_s24 }
  0x52   : > { %v1606_v14 = vsel %vm188_vm0, %v181_v5, %v182_v6  ;;  %v1610_v15 = vsel %vm188_vm0, %v180_v7, %v181_v5  ;;  %v1620_v17 = vsel %vm188_vm0, %v182_v6, %v183_v10  ;;  %v1624_v18 = vsel %vm188_vm0, %v183_v10, %v184_v11  ;;  %s1915_s21 = smul.u32 9, %s1906_s30 }
  0x53   : > { %220 = vrot.lane.b32.xlu1 %v1606_v14, %s1426_s10  ;;  %217 = vrot.lane.b32.xlu0 %v1610_v15, %s1426_s10  ;;  %v1635_v22 = vsel %vm188_vm0, %v184_v11, %v185_v19  ;;  %v1639_v23 = vsel %vm188_vm0, %v185_v19, %v186_v20  ;;  %v196_v24 = vsel %vm188_vm0, %v187_v21, %v180_v7  ;;  %v687_v29 = vrot.slane %v1586_v3, 1  ;;  %s844_s18 = sadd.s32 7, %s1909_s9  ;;  %s539_s17 = sadd.s32 3, %s1909_s9 }
  0x54   : > { %v1650_v25 = vsel %vm188_vm0, %v186_v20, %v187_v21  ;;  %v1652_v26 = vsel %vm197_vm1, 0.0, %v196_v24  ;;  %v1680_v30 = vsel %vm693_vm2, %v685_v27, %v686_v28  ;;  %v688_v31 = vrot.slane %v1594_v8, 1  ;;  %s863_s7 = sadd.s32 7, %s1915_s21  ;;  %s1921_s5 = sld [smem:[#allocation3 + %s844_s18]] }
  0x55   : > { %v1685_v32 = vsel %vm693_vm2, %v686_v28, %v687_v29  ;;  %v689_v33 = vrot.slane %v1596_v9, 1  ;;  %v690_v35 = vrot.slane %v1600_v12, 1  ;;  %v169_v37 = vadd.s32 56, %v1582_v1  ;;  %s558_s19 = sadd.s32 3, %s1915_s21  ;;  %s1924_s29 = sld [smem:[#allocation3 + %s863_s7]] }
  0x56   : > { %v1694_v34 = vsel %vm693_vm2, %v687_v29, %v688_v31  ;;  %v691_v38 = vrot.slane %v1602_v13, 1  ;;  %v692_v39 = vrot.slane %v1612_v16, 1  ;;  %s647_s11 = sadd.s32 5, %s1909_s9  ;;  %s342_s18 = sadd.s32 1, %s1909_s9  ;;  %vm970_vm7 = vcmask 523264  }
  0x57   : > { %223 = vrot.lane.b32.xlu1 %v1620_v17, %s1426_s10  ;;  %226 = vrot.lane.b32.xlu0 %v1624_v18, %s1426_s10  ;;  %v1699_v36 = vsel %vm693_vm2, %v688_v31, %v689_v33  ;;  %v1710_v40 = vsel %vm693_vm2, %v689_v33, %v690_v35  ;;  %vm709_vm3 = vcmp.eq.s32.totalorder %v169_v37, 63  ;;  %s1941_s7 = sld [smem:[#allocation3 + %s647_s11]]  ;;  %s596_s27 = sadd.s32 4, %s1915_s21 }
  0x58   : > { %v1714_v41 = vsel %vm693_vm2, %v690_v35, %v691_v38  ;;  %v701_v42 = vsel %vm693_vm2, %v692_v39, %v685_v27  ;;  %v1724_v43 = vsel %vm693_vm2, %v691_v38, %v692_v39  ;;  %s1955_s11 = sld [smem:[#allocation3 + %s1909_s9]]  ;;  %s806_s14 = sadd.s32 6, %s1909_s9 }
  0x59   : > { %v1726_v44 = vsel %vm709_vm3, 0.0, %v701_v42  ;;  %s1959_s4 = sld [smem:[#allocation3 + %s1915_s21]]  ;;  %s825_s15 = sadd.s32 6, %s1915_s21 }
  0x5a   : > { %s1975_s23 = sld [smem:[#allocation3 + %s596_s27]] }
  0x5b   : > { %229 = vrot.lane.b32.xlu1 %v1635_v22, %s1426_s10  ;;  %232 = vrot.lane.b32.xlu0 %v1639_v23, %s1426_s10  ;;  %s2001_s27 = sld [smem:[#allocation3 + %s806_s14]] }
  0x5f   : > { %235 = vrot.lane.b32.xlu1 %v1650_v25, %s1426_s10  ;;  %214 = vrot.lane.b32.xlu0 %v1652_v26, %s1426_s10 }
  0x63   : > { %454 = vrot.lane.b32.xlu1 %v1584_v2, %s1426_s10  ;;  %451 = vrot.lane.b32.xlu0 %v1589_v4, %s1426_s10 }
  0x67   : > { %460 = vrot.lane.b32.xlu1 %v1594_v8, %s1426_s10  ;;  %457 = vrot.lane.b32.xlu0 %v1586_v3, %s1426_s10 }
  0x6b   : > { %466 = vrot.lane.b32.xlu1 %v1600_v12, %s1426_s10  ;;  %463 = vrot.lane.b32.xlu0 %v1596_v9, %s1426_s10 }
  0x6f   : > { %472 = vrot.lane.b32.xlu1 %v1612_v16, %s1426_s10  ;;  %469 = vrot.lane.b32.xlu0 %v1602_v13, %s1426_s10 }
  0x73   : > { %718 = vrot.lane.b32.xlu0 %v1680_v30, %s1426_s10  ;;  %721 = vrot.lane.b32.xlu1 %v1685_v32, %s1426_s10 }
  0x77   : > { %724 = vrot.lane.b32.xlu0 %v1694_v34, %s1426_s10  ;;  %727 = vrot.lane.b32.xlu1 %v1699_v36, %s1426_s10 }
  0x7b   : > { %730 = vrot.lane.b32.xlu0 %v1710_v40, %s1426_s10  ;;  %733 = vrot.lane.b32.xlu1 %v1714_v41, %s1426_s10 }
  0x7f   : > { %736 = vrot.lane.b32.xlu0 %v1724_v43, %s1426_s10  ;;  %739 = vrot.lane.b32.xlu1 %v1726_v44, %s1426_s10 }
  0xc5   : > { %v221_v45 = vpop.permute.xlu1 %220  ;;  %v218_v46 = vpop.permute.xlu0 %217 }
  0xc6   : > { %v219_v11 = vsel %vm213_vm4, %v218_v46, %v1610_v15  ;;  %v222_v19 = vsel %vm213_vm4, %v221_v45, %v1606_v14 }
  0xc9   : > { %v224_v47 = vpop.permute.xlu1 %223  ;;  %v227_v48 = vpop.permute.xlu0 %226 }
  0xca   : > { %v225_v21 = vsel %vm213_vm4, %v224_v47, %v1620_v17  ;;  %v228_v24 = vsel %vm213_vm4, %v227_v48, %v1624_v18 }
  0xcd   : > { %v230_v49 = vpop.permute.xlu1 %229  ;;  %v233_v50 = vpop.permute.xlu0 %232 }
  0xce   : > { %v231_v29 = vsel %vm213_vm4, %v230_v49, %v1635_v22  ;;  %v234_v31 = vsel %vm213_vm4, %v233_v50, %v1639_v23 }
  0xd1   : > { %v236_v51 = vpop.permute.xlu1 %235  ;;  %v1732_v52 = vpop.permute.xlu0 %214 }
  0xd2   : > { %v237_v35 = vsel %vm213_vm4, %v236_v51, %v1650_v25 }
  0xd5   : > { %v455_v53 = vpop.permute.xlu1 %454  ;;  %v452_v54 = vpop.permute.xlu0 %451 }
  0xd6   : > { %v456_v55 = vsel %vm213_vm4, %v455_v53, %v1584_v2  ;;  %v453_v56 = vsel %vm213_vm4, %v452_v54, %v1589_v4  ;;  %v216_v54 = vsel %vm213_vm4, %v1732_v52, %v1652_v26 }
  0xd7   : > { %477 = vrot.lane.b32.xlu1 %v456_v55, %s1426_s10  ;;  %475 = vrot.lane.b32.xlu0 %v453_v56, %s1426_s10 }
  0xd9   : > { %v461_v57 = vpop.permute.xlu1 %460  ;;  %v458_v58 = vpop.permute.xlu0 %457 }
  0xda   : > { %v462_v59 = vsel %vm213_vm4, %v461_v57, %v1594_v8  ;;  %v459_v60 = vsel %vm213_vm4, %v458_v58, %v1586_v3 }
  0xdb   : > { %481 = vrot.lane.b32.xlu1 %v462_v59, %s1426_s10  ;;  %479 = vrot.lane.b32.xlu0 %v459_v60, %s1426_s10 }
  0xdd   : > { %v467_v61 = vpop.permute.xlu1 %466  ;;  %v464_v62 = vpop.permute.xlu0 %463 }
  0xde   : > { %v468_v63 = vsel %vm213_vm4, %v467_v61, %v1600_v12  ;;  %v465_v1 = vsel %vm213_vm4, %v464_v62, %v1596_v9 }
  0xdf   : > { %485 = vrot.lane.b32.xlu1 %v468_v63, %s1426_s10  ;;  %483 = vrot.lane.b32.xlu0 %v465_v1, %s1426_s10 }
  0xe1   : > { %v473_v5 = vpop.permute.xlu1 %472  ;;  %v470_v6 = vpop.permute.xlu0 %469 }
  0xe2   : > { %v474_v7 = vsel %vm213_vm4, %v473_v5, %v1612_v16  ;;  %v471_v10 = vsel %vm213_vm4, %v470_v6, %v1602_v13 }
  0xe3   : > { %489 = vrot.lane.b32.xlu1 %v474_v7, %s1426_s10  ;;  %487 = vrot.lane.b32.xlu0 %v471_v10, %s1426_s10 }
  0xe5   : > { %v719_v20 = vpop.permute.xlu0 %718  ;;  %v722_v28 = vpop.permute.xlu1 %721 }
  0xe6   : > { %v720_v33 = vsel %vm213_vm4, %v719_v20, %v1680_v30  ;;  %v723_v42 = vsel %vm213_vm4, %v722_v28, %v1685_v32 }
  0xe7   : > { %240 = vrot.lane.b32.xlu1 %v219_v11, %s1426_s10  ;;  %242 = vrot.lane.b32.xlu0 %v222_v19, %s1426_s10 }
  0xe9   : > { %v725_v27 = vpop.permute.xlu0 %724  ;;  %v728_v38 = vpop.permute.xlu1 %727 }
  0xea   : > { %v726_v39 = vsel %vm213_vm4, %v725_v27, %v1694_v34  ;;  %v729_v46 = vsel %vm213_vm4, %v728_v38, %v1699_v36 }
  0xeb   : > { %244 = vrot.lane.b32.xlu1 %v225_v21, %s1426_s10  ;;  %246 = vrot.lane.b32.xlu0 %v228_v24, %s1426_s10 }
  0xed   : > { %v731_v37 = vpop.permute.xlu0 %730  ;;  %v734_v48 = vpop.permute.xlu1 %733 }
  0xee   : > { %v732_v45 = vsel %vm213_vm4, %v731_v37, %v1710_v40  ;;  %v735_v50 = vsel %vm213_vm4, %v734_v48, %v1714_v41 }
  0xef   : > { %248 = vrot.lane.b32.xlu1 %v231_v29, %s1426_s10  ;;  %250 = vrot.lane.b32.xlu0 %v234_v31, %s1426_s10 }
  0xf1   : > { %v737_v47 = vpop.permute.xlu0 %736  ;;  %v740_v51 = vpop.permute.xlu1 %739 }
  0xf2   : > { %v738_v49 = vsel %vm213_vm4, %v737_v47, %v1724_v43  ;;  %v741_v53 = vsel %vm213_vm4, %v740_v51, %v1726_v44 }
  0xf3   : > { %252 = vrot.lane.b32.xlu1 %v237_v35, %s1426_s10  ;;  %742 = vrot.lane.b32.xlu0 %v720_v33, %s1426_s10 }
  0xf7   : > { %746 = vrot.lane.b32.xlu0 %v726_v39, %s1426_s10  ;;  %744 = vrot.lane.b32.xlu1 %v723_v42, %s1426_s10 }
  0xfb   : > { %750 = vrot.lane.b32.xlu0 %v732_v45, %s1426_s10  ;;  %748 = vrot.lane.b32.xlu1 %v729_v46, %s1426_s10 }
  0xff   : > { %754 = vrot.lane.b32.xlu0 %v738_v49, %s1426_s10  ;;  %752 = vrot.lane.b32.xlu1 %v735_v50, %s1426_s10 }
 0x103   : > { %238 = vrot.lane.b32.xlu0 %v216_v54, %s1426_s10  ;;  %756 = vrot.lane.b32.xlu1 %v741_v53, %s1426_s10  ;;  %s1927_s10 = sld [smem:[#allocation3 + %s539_s17]]  ;;  %s361_s17 = sadd.s32 1, %s1915_s21 }
 0x104   : > { %s362_s2 = sld [smem:[#allocation3 + %s361_s17]]  ;;  %s432_s17 = sadd.s32 2, %s1915_s21 }
 0x149   : > { %v478_v55 = vpop.permute.xlu1 %477  ;;  %v476_v56 = vpop.permute.xlu0 %475 }
 0x14a   : > { %v492_v57 = vsel %vm213_vm4, %v478_v55, %v1584_v2  ;;  %v491_v58 = vsel %vm213_vm4, %v476_v56, %v1589_v4 }
 0x14b   : > { %509 = vrot.lane.b32.xlu1 %v492_v57, %s1427_s8  ;;  %507 = vrot.lane.b32.xlu0 %v491_v58, %s1427_s8 }
 0x14d   : > { %v482_v59 = vpop.permute.xlu1 %481  ;;  %v480_v60 = vpop.permute.xlu0 %479 }
 0x14e   : > { %v494_v52 = vsel %vm213_vm4, %v482_v59, %v1594_v8  ;;  %v493_v61 = vsel %vm213_vm4, %v480_v60, %v1586_v3 }
 0x14f   : > { %513 = vrot.lane.b32.xlu1 %v494_v52, %s1427_s8  ;;  %511 = vrot.lane.b32.xlu0 %v493_v61, %s1427_s8 }
 0x151   : > { %v486_v62 = vpop.permute.xlu1 %485  ;;  %v484_v63 = vpop.permute.xlu0 %483 }
 0x152   : > { %v496_v1 = vsel %vm213_vm4, %v486_v62, %v1600_v12  ;;  %v495_v5 = vsel %vm213_vm4, %v484_v63, %v1596_v9  ;;  %v1912_v63 = vand.u32 127, %v161_v0 }
 0x153   : > { %517 = vrot.lane.b32.xlu1 %v496_v1, %s1427_s8  ;;  %515 = vrot.lane.b32.xlu0 %v495_v5, %s1427_s8 }
 0x154   : > { %vm262_vm5 = vcmp.eq.s32.totalorder %v1912_v63, 0  ;;  %vm380_vm6 = vcmp.eq.s32.totalorder %v1912_v63, 63 }
 0x155   : > { %v490_v6 = vpop.permute.xlu1 %489  ;;  %v488_v7 = vpop.permute.xlu0 %487 }
 0x156   : > { %v498_v10 = vsel %vm213_vm4, %v490_v6, %v1612_v16  ;;  %v497_v11 = vsel %vm213_vm4, %v488_v7, %v1602_v13 }
 0x157   : > { %521 = vrot.lane.b32.xlu1 %v498_v10, %s1427_s8  ;;  %519 = vrot.lane.b32.xlu0 %v497_v11, %s1427_s8 }
 0x159   : > { %v241_v19 = vpop.permute.xlu1 %240  ;;  %v243_v20 = vpop.permute.xlu0 %242 }
 0x15a   : > { %v255_v27 = vsel %vm213_vm4, %v241_v19, %v1610_v15  ;;  %v256_v28 = vsel %vm213_vm4, %v243_v20, %v1606_v14 }
 0x15b   : > { %617 = vrot.lane.b32.xlu1 %v492_v57, %s1428_s12  ;;  %615 = vrot.lane.b32.xlu0 %v491_v58, %s1428_s12 }
 0x15d   : > { %v245_v21 = vpop.permute.xlu1 %244  ;;  %v247_v24 = vpop.permute.xlu0 %246 }
 0x15e   : > { %v257_v31 = vsel %vm213_vm4, %v245_v21, %v1620_v17  ;;  %v258_v33 = vsel %vm213_vm4, %v247_v24, %v1624_v18 }
 0x15f   : > { %621 = vrot.lane.b32.xlu1 %v494_v52, %s1428_s12  ;;  %619 = vrot.lane.b32.xlu0 %v493_v61, %s1428_s12 }
 0x161   : > { %v249_v29 = vpop.permute.xlu1 %248  ;;  %v251_v35 = vpop.permute.xlu0 %250 }
 0x162   : > { %v259_v37 = vsel %vm213_vm4, %v249_v29, %v1635_v22  ;;  %v260_v38 = vsel %vm213_vm4, %v251_v35, %v1639_v23  ;;  %v1985_v29 = vstv %s1924_s29  ;;  %s2018_s29 = sld [smem:[#allocation3 + %s825_s15]]  ;;  %s2781_s15 = sshll.u32 %s1403_s24, 1 }
 0x163   : > { %625 = vrot.lane.b32.xlu1 %v496_v1, %s1428_s12  ;;  %623 = vrot.lane.b32.xlu0 %v495_v5, %s1428_s12 }
 0x165   : > { %v253_v39 = vpop.permute.xlu1 %252  ;;  %v743_v45 = vpop.permute.xlu0 %742 }
 0x166   : > { %v261_v42 = vsel %vm213_vm4, %v253_v39, %v1650_v25  ;;  %v758_v47 = vsel %vm213_vm4, %v743_v45, %v1680_v30  ;;  %v1999_v39 = vstv %s362_s2  ;;  %v2010_v45 = vmul.f32 %v1985_v29, %v1680_v30  ;;  %s933_s2 = sadd.s32 8, %s1915_s21 }
 0x167   : > { %629 = vrot.lane.b32.xlu1 %v498_v10, %s1428_s12  ;;  %627 = vrot.lane.b32.xlu0 %v497_v11, %s1428_s12  ;;  %s2066_s14 = sld [smem:[#allocation3 + %s933_s2]] }
 0x168   : > { %2780 = vst [vmem:[#allocation21_spill] sm:$0xff] %v2010_v45 }
 0x169   : > { %v747_v46 = vpop.permute.xlu0 %746  ;;  %v745_v48 = vpop.permute.xlu1 %744 }
 0x16a   : > { %v760_v49 = vsel %vm213_vm4, %v747_v46, %v1694_v34  ;;  %v759_v53 = vsel %vm213_vm4, %v745_v48, %v1685_v32  ;;  %v2013_v46 = vstv %s1927_s10  ;;  %v2022_v48 = vstv %s1941_s7 }
 0x16b   : > { %273 = vrot.lane.b32.xlu1 %v255_v27, %s1427_s8  ;;  %275 = vrot.lane.b32.xlu0 %v256_v28, %s1427_s8 }
 0x16d   : > { %v751_v50 = vpop.permute.xlu0 %750  ;;  %v749_v51 = vpop.permute.xlu1 %748 }
 0x16e   : > { %v762_v54 = vsel %vm213_vm4, %v751_v50, %v1710_v40  ;;  %v761_v56 = vsel %vm213_vm4, %v749_v51, %v1699_v36  ;;  %v2028_v50 = vstv %s1955_s11  ;;  %v2031_v51 = vstv %s1959_s4 }
 0x16f   : > { %277 = vrot.lane.b32.xlu1 %v257_v31, %s1427_s8  ;;  %279 = vrot.lane.b32.xlu0 %v258_v33, %s1427_s8 }
 0x171   : > { %v755_v55 = vpop.permute.xlu0 %754  ;;  %v753_v58 = vpop.permute.xlu1 %752 }
 0x172   : > { %v764_v57 = vsel %vm213_vm4, %v755_v55, %v1724_v43  ;;  %v763_v59 = vsel %vm213_vm4, %v753_v58, %v1714_v41  ;;  %v2041_v55 = vmul.f32 %v1999_v39, %v1610_v15 }
 0x173   : > { %281 = vrot.lane.b32.xlu1 %v259_v37, %s1427_s8  ;;  %283 = vrot.lane.b32.xlu0 %v260_v38, %s1427_s8 }
 0x175   : > { %v239_v60 = vpop.permute.xlu0 %238  ;;  %v757_v61 = vpop.permute.xlu1 %756 }
 0x176   : > { %v254_v52 = vsel %vm213_vm4, %v239_v60, %v1652_v26  ;;  %v765_v62 = vsel %vm213_vm4, %v757_v61, %v1726_v44  ;;  %v2074_v61 = vmul.f32 %v1999_v39, %v1624_v18 }
 0x177   : > { %285 = vrot.lane.b32.xlu1 %v261_v42, %s1427_s8  ;;  %385 = vrot.lane.b32.xlu0 %v256_v28, %s1428_s12  ;;  %v1982_v28 = vstv %s1921_s5  ;;  %s914_s5 = sadd.s32 8, %s1909_s9 }
 0x178   : > { %s2051_s4 = sld [smem:[#allocation3 + %s914_s5]] }
 0x17b   : > { %383 = vrot.lane.b32.xlu1 %v255_v27, %s1428_s12  ;;  %389 = vrot.lane.b32.xlu0 %v258_v33, %s1428_s12 }
 0x17f   : > { %387 = vrot.lane.b32.xlu1 %v257_v31, %s1428_s12  ;;  %393 = vrot.lane.b32.xlu0 %v260_v38, %s1428_s12 }
 0x183   : > { %391 = vrot.lane.b32.xlu1 %v259_v37, %s1428_s12  ;;  %774 = vrot.lane.b32.xlu0 %v758_v47, %s1427_s8 }
 0x187   : > { %395 = vrot.lane.b32.xlu1 %v261_v42, %s1428_s12  ;;  %778 = vrot.lane.b32.xlu0 %v760_v49, %s1427_s8  ;;  %v2006_v42 = vmul.f32 %v1982_v28, %v1680_v30 }
 0x189   : > { %2779 = vst [vmem:[#allocation20_spill] sm:$0xff] %v2006_v42 }
 0x18b   : > { %776 = vrot.lane.b32.xlu1 %v759_v53, %s1427_s8  ;;  %782 = vrot.lane.b32.xlu0 %v762_v54, %s1427_s8 }
 0x18f   : > { %780 = vrot.lane.b32.xlu1 %v761_v56, %s1427_s8  ;;  %786 = vrot.lane.b32.xlu0 %v764_v57, %s1427_s8 }
 0x193   : > { %784 = vrot.lane.b32.xlu1 %v763_v59, %s1427_s8  ;;  %882 = vrot.lane.b32.xlu0 %v758_v47, %s1428_s12 }
 0x197   : > { %884 = vrot.lane.b32.xlu1 %v759_v53, %s1428_s12  ;;  %271 = vrot.lane.b32.xlu0 %v254_v52, %s1427_s8 }
 0x19b   : > { %888 = vrot.lane.b32.xlu1 %v761_v56, %s1428_s12  ;;  %381 = vrot.lane.b32.xlu0 %v254_v52, %s1428_s12 }
 0x19f   : > { %892 = vrot.lane.b32.xlu1 %v763_v59, %s1428_s12  ;;  %886 = vrot.lane.b32.xlu0 %v760_v49, %s1428_s12  ;;  %v2059_v59 = vmul.f32 %v1999_v39, %v1606_v14 }
 0x1a3   : > { %788 = vrot.lane.b32.xlu1 %v765_v62, %s1427_s8  ;;  %890 = vrot.lane.b32.xlu0 %v762_v54, %s1428_s12  ;;  %s666_s8 = sadd.s32 5, %s1915_s21  ;;  %s1132_s21 = sshll.u32 %s1407_s25, 6 }
 0x1a4   : > { %s1944_s6 = sld [smem:[#allocation3 + %s666_s8]]  ;;  %s577_s8 = sadd.s32 4, %s1909_s9 }
 0x1a5   : > { %s1972_s26 = sld [smem:[#allocation3 + %s577_s8]] }
 0x1a6   : > { %s1987_s8 = sld [smem:[#allocation3 + %s432_s17]]  ;;  %s1429_s17 = smov [#allocation8]  }
 0x1a7   : > { %896 = vrot.lane.b32.xlu1 %v765_v62, %s1428_s12  ;;  %894 = vrot.lane.b32.xlu0 %v764_v57, %s1428_s12  ;;  %s1930_s12 = sld [smem:[#allocation3 + %s558_s19]]  ;;  %v2087_v62 = vmul.f32 %v1999_v39, %v1635_v22 }
 0x1a8   : > { %s343_s19 = sld [smem:[#allocation3 + %s342_s18]]  ;;  %s413_s18 = sadd.s32 2, %s1909_s9 }
 0x1a9   : > { %s1977_s22 = sld [smem:[#allocation3 + %s413_s18]]  ;;  %s1137_s9 = sshll.u32 %s1403_s24, 4 }
 0x1aa   : > { %v2025_v49 = vstv %s1944_s6  ;;  %s2083_s6 = sld [smem:[#allocation4 + %s2781_s15]]  ;;  %s1020_s24 = sadd.s32 %s1137_s9, %s1132_s21 }
 0x1ab   : > { %v579_v60 = vstv %s1972_s26  ;;  %s1133_s25 = sshll.u32 %s1020_s24, 7 }
 0x1ac   : > { %v2137_v42 = vmul.f32 %v579_v60, %v1596_v9 }
 0x1ad   : > { %v2016_v47 = vstv %s1930_s12 }
 0x1ae   : > { %v1997_v38 = vstv %s343_s19  ;;  %2786 = vst [vmem:[#allocation26_spill] sm:$0xff] %v2137_v42  ;;  %s2678_s19 = scalar_lea.hbm %s2750_s3, %s1133_s25 }
 0x1af   : > { %v2037_v54 = vmul.f32 %v1997_v38, %v1610_v15  ;;  %v2045_v56 = vmul.f32 %v1997_v38, %v1606_v14  ;;  %v2049_v57 = vmul.f32 %v1997_v38, %v1620_v17  ;;  %v2063_v15 = vmul.f32 %v1999_v39, %v1620_v17 }
 0x1b0   : > { %v2070_v52 = vmul.f32 %v1997_v38, %v1624_v18  ;;  %v2078_v14 = vmul.f32 %v1997_v38, %v1635_v22  ;;  %v598_v17 = vstv %s1975_s23  ;;  %v2095_v18 = vmul.f32 %v1999_v39, %v1639_v23  ;;  %s2102_s23 = sld [smem:[#allocation4 + %s1906_s30]] }
 0x1b1   : > { %v2110_v22 = vmul.f32 %v1999_v39, %v1650_v25  ;;  %v2131_v45 = vmul.f32 %v598_v17, %v1584_v2  ;;  %v2158_v42 = vmul.f32 %v598_v17, %v1600_v12 }
 0x1b3   : > { %2782 = vst [vmem:[#allocation22_spill] sm:$0xff] %v2110_v22  ;;  %2785 = vst [vmem:[#allocation25_spill] sm:$0xff] %v2131_v45  ;;  %v2140_v22 = vmul.f32 %v598_v17, %v1596_v9  ;;  %v2155_v45 = vmul.f32 %v579_v60, %v1600_v12  ;;  %v2180_v12 = vmul.f32 %v598_v17, %v1612_v16 }
 0x1b4   : > { %2791 = vst [vmem:[#allocation31_spill] sm:$0xff] %v2158_v42  ;;  %v2187_v42 = vstv %s2051_s4 }
 0x1b5   : > { %2787 = vst [vmem:[#allocation27_spill] sm:$0xff] %v2140_v22  ;;  %2790 = vst [vmem:[#allocation30_spill] sm:$0xff] %v2155_v45  ;;  %v2174_v45 = vmul.f32 %v1985_v29, %v1685_v32 }
 0x1b6   : > { %2797 = vst [vmem:[#allocation37_spill] sm:$0xff] %v2180_v12  ;;  %2799 = vst [vmem:[#allocation39_spill] sm:$0xff] %v2187_v42  ;;  %v2205_v12 = vstv %s2083_s6 }
 0x1b7   : > { %2795 = vst [vmem:[#allocation35_spill] sm:$0xff] %v2174_v45  ;;  %2804 = vst [vmem:[#allocation44_spill] sm:$0xff] %v2205_v12  ;;  %v2231_v12 = vmul.f32 %v579_v60, %v1589_v4 }
 0x1b9   : > { %2811 = vst [vmem:[#allocation51_spill] sm:$0xff] %v2231_v12 }
 0x1bd   : > { %v510_v0 = vpop.permute.xlu1 %509  ;;  %v508_v1 = vpop.permute.xlu0 %507 }
 0x1be   : > { %v1934_v5 = vsel %vm262_vm5, 0.0, %v510_v0  ;;  %v1938_v6 = vsel %vm262_vm5, 0.0, %v508_v1  ;;  %v2091_v0 = vmul.f32 %v1997_v38, %v1639_v23  ;;  %v2099_v1 = vmul.f32 %v1997_v38, %v1650_v25 }
 0x1bf   : > { %v2119_v23 = vmul.f32 %v579_v60, %v1586_v3  ;;  %v2134_v25 = vstv %s2018_s29 }
 0x1c1   : > { %v514_v7 = vpop.permute.xlu1 %513  ;;  %v512_v10 = vpop.permute.xlu0 %511 }
 0x1c2   : > { %v1948_v11 = vsel %vm262_vm5, 0.0, %v514_v7  ;;  %v1952_v19 = vsel %vm262_vm5, 0.0, %v512_v10 }
 0x1c5   : > { %v518_v20 = vpop.permute.xlu1 %517  ;;  %v516_v21 = vpop.permute.xlu0 %515 }
 0x1c6   : > { %v1965_v24 = vsel %vm262_vm5, 0.0, %v518_v20  ;;  %v1969_v27 = vsel %vm262_vm5, 0.0, %v516_v21  ;;  %v2113_v20 = vstv %s1977_s22  ;;  %v2116_v21 = vstv %s1987_s8  ;;  %s156_s22 = sand.u32 1, %s1383_s1   ;;  %s1301_s8 = sshll.u32 %s1429_s17, 4  ;;  %s1302_s8 = int_to_ptr.vmem [resolvable:$false] %s1301_s8 }
 0x1c7   : > { %s1119_s26 = sshll.u32 %s156_s22, 7  ;;  %s2688_s11 = scalar_lea.sflag [#allocation7], %s156_s22 }
 0x1c8   : > { %s2586_s30 = scalar_lea.vmem [#allocation8], %s1119_s26 }
 0x1c9   : > { %v522_v31 = vpop.permute.xlu1 %521  ;;  %v520_v33 = vpop.permute.xlu0 %519  ;;  %s1023_s10 = sshll.u32 %s2586_s30, 4  ;;  %s2680_s10 = int_to_ptr.vmem [resolvable:$true] %s1023_s10 }
 0x1ca   : > { %v1991_v35 = vsel %vm262_vm5, 0.0, %v522_v31  ;;  %v1995_v37 = vsel %vm262_vm5, 0.0, %v520_v33  ;;  %v2122_v31 = vstv %s2001_s27  ;;  %v2125_v33 = vmul.f32 %v598_v17, %v1586_v3  ;;  %s1297_s18 = scalar_lea.vmem %s2680_s10, 2048  ;;  %s1303_s27 = scalar_lea.vmem %s1302_s8, 4096 }
 0x1cb   : > { %2783 = vst [vmem:[#allocation23_spill] sm:$0xff] %v2122_v31  ;;  %v2143_v31 = vmul.f32 %v579_v60, %v1594_v8  ;;  %v2146_v3 = vmul.f32 %v598_v17, %v1594_v8  ;;  %v2162_v8 = vmul.f32 %v1982_v28, %v1685_v32  ;;  %v2195_v32 = vmul.f32 %v1985_v29, %v1699_v36  ;;  %p1298_p12 = scmp.ne.s32.totalorder %s2680_s10, %s1297_s18  ;;  %p1304_p13 = scmp.lt.s32.totalorder %s2680_s10, %s1302_s8 }
 0x1cc   : > { %p1305_p0 = scmp.lt.s32.totalorder %s1303_s27, %s1297_s18 }
 0x1cd   : > { %v2033_v53 = vpop.permute.xlu1 %617  ;;  %v616_v30 = vpop.permute.xlu0 %615  ;;  %2792 = vst [vmem:[#allocation32_spill] sm:$0xff] %v2162_v8  ;;  %v2184_v8 = vmul.f32 %v1982_v28, %v1710_v40  ;;  %2801 = vst [vmem:[#allocation41_spill] sm:$0xff] %v2195_v32  ;;  %p1299_p9 = pnand %p1298_p12, %p1540_p3 }
 0x1ce   : > { %v2055_v58 = vsel %vm380_vm6, 0.0, %v616_v30  ;;  %v2128_v30 = vmul.f32 %v579_v60, %v1584_v2  ;;  %v2152_v2 = vmul.f32 %v598_v17, %v1602_v13  ;;  %p1306_p1 = por %p1305_p0, %p1304_p13 }
 0x1cf   : > { %2798 = vst [vmem:[#allocation38_spill] sm:$0xff] %v2184_v8  ;;  %v2212_v8 = vmul.f32 %v1982_v28, %v1714_v41  ;;  %p1300_p10 = pneg %p1299_p9 }
 0x1d0   : > { %2784 = vst [vmem:[#allocation24_spill] sm:$0xff] %v2128_v30  ;;  %v2149_v30 = vmul.f32 %v579_v60, %v1602_v13  ;;  %2789 = vst [vmem:[#allocation29_spill] sm:$0xff] %v2152_v2  ;;  %v2170_v13 = vmul.f32 %v1985_v29, %v1694_v34  ;;  %v2177_v2 = vmul.f32 %v579_v60, %v1612_v16  ;;  %v2202_v16 = vstv %s2066_s14 }
 0x1d1   : > { %v2104_v7 = vpop.permute.xlu1 %621  ;;  %v2106_v10 = vpop.permute.xlu0 %619  ;;  %2803 = vst [vmem:[#allocation43_spill] sm:$0xff] %v2202_v16  ;;  %2806 = vst [vmem:[#allocation46_spill] sm:$0xff] %v2212_v8  ;;  %v2234_v8 = vmul.f32 %v598_v17, %v1589_v4  ;;  %v2254_v4 = vmul.f32 %v2013_v46, %v1938_v6  ;;  %v2266_v60 = vmul.f32 %v2013_v46, %v1948_v11  ;;  %p1307_p2 = pnand %p1306_p1, %p1300_p10 }
 0x1d2   : > { %2788 = vst [vmem:[#allocation28_spill] sm:$0xff] %v2149_v30  ;;  %v2166_v30 = vmul.f32 %v1982_v28, %v1694_v34  ;;  %2794 = vst [vmem:[#allocation34_spill] sm:$0xff] %v2170_v13  ;;  %v2191_v34 = vmul.f32 %v1982_v28, %v1699_v36  ;;  %v2208_v13 = vstv %s2102_s23  ;;  %v2216_v36 = vmul.f32 %v1997_v38, %v1652_v26 }
 0x1d3   : > { %2796 = vst [vmem:[#allocation36_spill] sm:$0xff] %v2177_v2  ;;  %v2199_v2 = vmul.f32 %v1985_v29, %v1710_v40  ;;  %2805 = vst [vmem:[#allocation45_spill] sm:$0xff] %v2208_v13  ;;  %v2220_v40 = vmul.f32 %v1999_v39, %v1652_v26  ;;  %v2228_v13 = vmul.f32 %v1982_v28, %v1724_v43  ;;  %v641_v12 = vsel %vm380_vm6, 0.0, %v2106_v10 }
 0x1d4   : > { %2793 = vst [vmem:[#allocation33_spill] sm:$0xff] %v2166_v30  ;;  %2800 = vst [vmem:[#allocation40_spill] sm:$0xff] %v2191_v34  ;;  %v2238_v38 = vmul.f32 %v1982_v28, %v1726_v44  ;;  %v2242_v26 = vmul.f32 %v1985_v29, %v1724_v43  ;;  %v2250_v39 = vmul.f32 %v2016_v47, %v1934_v5 }
 0x1d5   : > { %v626_v9 = vpop.permute.xlu1 %625  ;;  %v624_v22 = vpop.permute.xlu0 %623  ;;  %2802 = vst [vmem:[#allocation42_spill] sm:$0xff] %v2199_v2  ;;  %2807 = vst [vmem:[#allocation47_spill] sm:$0xff] %v2216_v36  ;;  %v2224_v2 = vmul.f32 %v1985_v29, %v1714_v41  ;;  %v2246_v41 = vmul.f32 %v2013_v46, %v1934_v5  ;;  %v2258_v28 = vmul.f32 %v1985_v29, %v1726_v44 }
 0x1d6   : > { %2808 = vst [vmem:[#allocation48_spill] sm:$0xff] %v2220_v40  ;;  %2810 = vst [vmem:[#allocation50_spill] sm:$0xff] %v2228_v13  ;;  %v2262_v43 = vmul.f32 %v2016_v47, %v1938_v6  ;;  %v2270_v5 = vmul.f32 %v2016_v47, %v1948_v11  ;;  %v2274_v17 = vmul.f32 %v2013_v46, %v1952_v19  ;;  %v640_v11 = vsel %vm380_vm6, 0.0, %v2033_v53 }
 0x1d7   : > { %2809 = vst [vmem:[#allocation49_spill] sm:$0xff] %v2224_v2  ;;  %2812 = vst [vmem:[#allocation52_spill] sm:$0xff] %v2234_v8  ;;  %v2278_v44 = vmul.f32 %v2016_v47, %v1952_v19  ;;  %v2282_v6 = vmul.f32 %v2013_v46, %v1965_v24  ;;  %v2286_v29 = vmul.f32 %v2016_v47, %v1965_v24  ;;  %v642_v24 = vsel %vm380_vm6, 0.0, %v2104_v7 }
 0x1d8   : > { %2813 = vst [vmem:[#allocation53_spill] sm:$0xff] %v2238_v38  ;;  %2814 = vst [vmem:[#allocation54_spill] sm:$0xff] %v2242_v26  ;;  %v2293_v38 = vmul.f32 %v2013_v46, %v1969_v27  ;;  %v2297_v19 = vmul.f32 %v2016_v47, %v1969_v27  ;;  %v2301_v13 = vmul.f32 %v2013_v46, %v1991_v35  ;;  %v643_v10 = vsel %vm380_vm6, 0.0, %v624_v22 }
 0x1d9   : > { %v630_v30 = vpop.permute.xlu1 %629  ;;  %v628_v34 = vpop.permute.xlu0 %627  ;;  %2815 = vst [vmem:[#allocation55_spill] sm:$0xff] %v2254_v4  ;;  %2816 = vst [vmem:[#allocation56_spill] sm:$0xff] %v2258_v28  ;;  %v2308_v53 = vmul.f32 %v2016_v47, %v1991_v35  ;;  %v2312_v8 = vmul.f32 %v2013_v46, %v1995_v37  ;;  %v2316_v27 = vmul.f32 %v2016_v47, %v1995_v37  ;;  %v644_v46 = vsel %vm380_vm6, 0.0, %v626_v9 }
 0x1da   : > { %2817 = vst [vmem:[#allocation57_spill] sm:$0xff] %v2262_v43  ;;  %v2322_v43 = vmul.f32 %v2022_v48, %v640_v11  ;;  %v2325_v7 = vmul.f32 %v2025_v49, %v640_v11  ;;  %v2329_v35 = vmul.f32 %v2022_v48, %v2055_v58  ;;  %v2335_v37 = vmul.f32 %v2025_v49, %v2055_v58 }
 0x1db   : > { %v2338_v47 = vmul.f32 %v2022_v48, %v642_v24  ;;  %v2348_v9 = vmul.f32 %v2022_v48, %v641_v12  ;;  %v2351_v58 = vmul.f32 %v2025_v49, %v641_v12  ;;  %v2356_v36 = vmul.f32 %v2022_v48, %v644_v46 }
 0x1dc   : > { %2818 = vst [vmem:[#allocation58_spill] sm:$0xff] %v2329_v35  ;;  %2819 = vst [vmem:[#allocation59_spill] sm:$0xff] %v2335_v37  ;;  %v2345_v35 = vmul.f32 %v2025_v49, %v642_v24  ;;  %v2359_v22 = vmul.f32 %v2025_v49, %v644_v46  ;;  %v645_v24 = vsel %vm380_vm6, 0.0, %v628_v34  ;;  %v2366_v2 = vmul.f32 %v2022_v48, %v643_v10 }
 0x1dd   : > { %v274_v26 = vpop.permute.xlu1 %273  ;;  %v276_v28 = vpop.permute.xlu0 %275  ;;  %2820 = vst [vmem:[#allocation60_spill] sm:$0xff] %v2338_v47  ;;  %2822 = vst [vmem:[#allocation62_spill] sm:$0xff] %v2356_v36  ;;  %v2373_v16 = vmul.f32 %v2025_v49, %v643_v10  ;;  %v2391_v45 = vmul.f32 %v2025_v49, %v645_v24 }
 0x1de   : > { %v296_v11 = vsel %vm262_vm5, 0.0, %v274_v26  ;;  %2821 = vst [vmem:[#allocation61_spill] sm:$0xff] %v2345_v35  ;;  %v297_v37 = vsel %vm262_vm5, 0.0, %v276_v28  ;;  %2823 = vst [vmem:[#allocation63_spill] sm:$0xff] %v2359_v22  ;;  %v646_v26 = vsel %vm380_vm6, 0.0, %v630_v30 }
 0x1df   : > { %v307_v12 = vmul.f32 %v2028_v50, %v296_v11  ;;  %v327_v32 = vmul.f32 %v2031_v51, %v296_v11  ;;  %v308_v46 = vmul.f32 %v2028_v50, %v297_v37  ;;  %v328_v30 = vmul.f32 %v2031_v51, %v297_v37  ;;  %2827 = vst [vmem:[#allocation67_spill] sm:$0xff] %v2391_v45 }
 0x1e0   : > { %v2380_v36 = vmul.f32 %v2022_v48, %v646_v26  ;;  %v2383_v11 = vmul.f32 %v2025_v49, %v646_v26 }
 0x1e1   : > { %v278_v4 = vpop.permute.xlu1 %277  ;;  %v280_v40 = vpop.permute.xlu0 %279  ;;  %v373_v26 = vadd.f32 %v2041_v55, %v327_v32  ;;  %v374_v49 = vadd.f32 %v2059_v59, %v328_v30 }
 0x1e2   : > { %v298_v28 = vsel %vm262_vm5, 0.0, %v278_v4  ;;  %v299_v34 = vsel %vm262_vm5, 0.0, %v280_v40  ;;  %2824 = vst [vmem:[#allocation64_spill] sm:$0xff] %v2380_v36  ;;  %2825 = vst [vmem:[#allocation65_spill] sm:$0xff] %v2383_v11  ;;  %v2386_v4 = vmul.f32 %v2022_v48, %v645_v24  ;;  %v354_v36 = vadd.f32 %v2037_v54, %v307_v12 }
 0x1e3   : > { %v309_v37 = vmul.f32 %v2028_v50, %v298_v28  ;;  %v329_v40 = vmul.f32 %v2031_v51, %v298_v28  ;;  %v310_v48 = vmul.f32 %v2028_v50, %v299_v34  ;;  %v330_v11 = vmul.f32 %v2031_v51, %v299_v34 }
 0x1e4   : > { %2826 = vst [vmem:[#allocation66_spill] sm:$0xff] %v2386_v4 }
 0x1e5   : > { %v282_v42 = vpop.permute.xlu1 %281  ;;  %v284_v22 = vpop.permute.xlu0 %283  ;;  %v375_v59 = vadd.f32 %v2063_v15, %v329_v40  ;;  %v357_v30 = vadd.f32 %v2070_v52, %v310_v48  ;;  %v376_v34 = vadd.f32 %v2074_v61, %v330_v11 }
 0x1e6   : > { %v300_v10 = vsel %vm262_vm5, 0.0, %v282_v42  ;;  %v301_v35 = vsel %vm262_vm5, 0.0, %v284_v22  ;;  %v355_v42 = vadd.f32 %v2045_v56, %v308_v46  ;;  %v356_v56 = vadd.f32 %v2049_v57, %v309_v37 }
 0x1e7   : > { %v311_v24 = vmul.f32 %v2028_v50, %v300_v10  ;;  %v331_v45 = vmul.f32 %v2031_v51, %v300_v10  ;;  %v312_v22 = vmul.f32 %v2028_v50, %v301_v35  ;;  %v332_v54 = vmul.f32 %v2031_v51, %v301_v35 }
 0x1e9   : > { %v286_v28 = vpop.permute.xlu1 %285  ;;  %v386_v4 = vpop.permute.xlu0 %385  ;;  %v359_v40 = vadd.f32 %v2091_v0, %v312_v22 }
 0x1ea   : > { %v302_v55 = vsel %vm262_vm5, 0.0, %v286_v28  ;;  %v407_v32 = vsel %vm380_vm6, 0.0, %v386_v4  ;;  %v358_v28 = vadd.f32 %v2078_v14, %v311_v24  ;;  %v377_v4 = vadd.f32 %v2087_v62, %v331_v45 }
 0x1eb   : > { %v418_v12 = vmul.f32 %v2113_v20, %v407_v32  ;;  %v437_v46 = vmul.f32 %v2116_v21, %v407_v32  ;;  %v313_v35 = vmul.f32 %v2028_v50, %v302_v55  ;;  %v333_v10 = vmul.f32 %v2031_v51, %v302_v55 }
 0x1ec   : > { %v378_v32 = vadd.f32 %v2095_v18, %v332_v54 }
 0x1ed   : > { %v426_v47 = vadd.f32 %v418_v12, %v355_v42  ;;  %v445_v57 = vadd.f32 %v437_v46, %v374_v49  ;;  %v384_v37 = vpop.permute.xlu1 %383  ;;  %v390_v15 = vpop.permute.xlu0 %389  ;;  %v360_v48 = vadd.f32 %v2099_v1, %v313_v35  ;;  %v2828_v42 = vld [vmem:[#allocation22_spill] sm:$0xff] }
 0x1ee   : > { %v406_v52 = vsel %vm380_vm6, 0.0, %v384_v37  ;;  %v409_v61 = vsel %vm380_vm6, 0.0, %v390_v15  ;;  %v379_v0 = vadd.f32 %v2828_v42, %v333_v10 }
 0x1ef   : > { %v552_v11 = vadd.f32 %v2274_v17, %v426_v47  ;;  %v571_v14 = vadd.f32 %v2278_v44, %v445_v57  ;;  %v417_v45 = vmul.f32 %v2113_v20, %v406_v52  ;;  %v436_v62 = vmul.f32 %v2116_v21, %v406_v52 }
 0x1f0   : > { %v420_v18 = vmul.f32 %v2113_v20, %v409_v61  ;;  %v439_v49 = vmul.f32 %v2116_v21, %v409_v61 }
 0x1f1   : > { %v425_v24 = vadd.f32 %v417_v45, %v354_v36  ;;  %v444_v22 = vadd.f32 %v436_v62, %v373_v26  ;;  %v388_v54 = vpop.permute.xlu1 %387  ;;  %v394_v55 = vpop.permute.xlu0 %393  ;;  %v590_v17 = vadd.f32 %v2119_v23, %v552_v11  ;;  %v609_v44 = vadd.f32 %v2125_v33, %v571_v14 }
 0x1f2   : > { %v428_v47 = vadd.f32 %v420_v18, %v357_v30  ;;  %v447_v12 = vadd.f32 %v439_v49, %v376_v34  ;;  %v408_v46 = vsel %vm380_vm6, 0.0, %v388_v54  ;;  %v411_v1 = vsel %vm380_vm6, 0.0, %v394_v55 }
 0x1f3   : > { %v551_v35 = vadd.f32 %v2246_v41, %v425_v24  ;;  %v570_v10 = vadd.f32 %v2250_v39, %v444_v22  ;;  %v419_v36 = vmul.f32 %v2113_v20, %v408_v46  ;;  %v438_v26 = vmul.f32 %v2116_v21, %v408_v46  ;;  %v2830_v24 = vld [vmem:[#allocation24_spill] sm:$0xff]  ;;  %v2831_v22 = vld [vmem:[#allocation25_spill] sm:$0xff] }
 0x1f4   : > { %v554_v23 = vadd.f32 %v2293_v38, %v428_v47  ;;  %v573_v33 = vadd.f32 %v2297_v19, %v447_v12  ;;  %v422_v30 = vmul.f32 %v2113_v20, %v411_v1  ;;  %v441_v34 = vmul.f32 %v2116_v21, %v411_v1 }
 0x1f5   : > { %v427_v57 = vadd.f32 %v419_v36, %v356_v56  ;;  %v446_v37 = vadd.f32 %v438_v26, %v375_v59  ;;  %v392_v15 = vpop.permute.xlu1 %391  ;;  %v775_v52 = vpop.permute.xlu0 %774  ;;  %v660_v41 = vadd.f32 %v2348_v9, %v590_v17  ;;  %v679_v39 = vadd.f32 %v2351_v58, %v609_v44  ;;  %v2833_v44 = vld [vmem:[#allocation27_spill] sm:$0xff] }
 0x1f6   : > { %v430_v61 = vadd.f32 %v422_v30, %v359_v40  ;;  %v449_v11 = vadd.f32 %v441_v34, %v378_v32  ;;  %v410_v14 = vsel %vm380_vm6, 0.0, %v392_v15  ;;  %v798_v38 = vsel %vm262_vm5, 0.0, %v775_v52  ;;  %v2829_v40 = vld [vmem:[#allocation23_spill] sm:$0xff] }
 0x1f7   : > { %v553_v19 = vadd.f32 %v2266_v60, %v427_v57  ;;  %v572_v45 = vadd.f32 %v2270_v5, %v446_v37  ;;  %v421_v56 = vmul.f32 %v2113_v20, %v410_v14  ;;  %v440_v59 = vmul.f32 %v2116_v21, %v410_v14  ;;  %v2834_v14 = vld [vmem:[#allocation28_spill] sm:$0xff] }
 0x1f8   : > { %v556_v9 = vadd.f32 %v2312_v8, %v430_v61  ;;  %v575_v58 = vadd.f32 %v2316_v27, %v449_v11  ;;  %v2462_v32 = vmul.f32 %v2829_v40, %v798_v38  ;;  %v2465_v62 = vmul.f32 %v2134_v25, %v798_v38  ;;  %v2832_v27 = vld [vmem:[#allocation26_spill] sm:$0xff] }
 0x1f9   : > { %v429_v42 = vadd.f32 %v421_v56, %v358_v28  ;;  %v448_v18 = vadd.f32 %v440_v59, %v377_v4  ;;  %v396_v49 = vpop.permute.xlu1 %395  ;;  %v779_v60 = vpop.permute.xlu0 %778  ;;  %v589_v5 = vadd.f32 %v2830_v24, %v551_v35  ;;  %v608_v54 = vadd.f32 %v2831_v22, %v570_v10 }
 0x1fa   : > { %v412_v55 = vsel %vm380_vm6, 0.0, %v396_v49  ;;  %v800_v8 = vsel %vm262_vm5, 0.0, %v779_v60  ;;  %v592_v17 = vadd.f32 %v2832_v27, %v554_v23  ;;  %v611_v47 = vadd.f32 %v2833_v44, %v573_v33  ;;  %v2837_v60 = vld [vmem:[#allocation61_spill] sm:$0xff] }
 0x1fb   : > { %v555_v12 = vadd.f32 %v2282_v6, %v429_v42  ;;  %v574_v28 = vadd.f32 %v2286_v29, %v448_v18  ;;  %v423_v4 = vmul.f32 %v2113_v20, %v412_v55  ;;  %v442_v46 = vmul.f32 %v2116_v21, %v412_v55  ;;  %v2836_v18 = vld [vmem:[#allocation60_spill] sm:$0xff] }
 0x1fc   : > { %v811_v1 = vmul.f32 %v2829_v40, %v800_v8  ;;  %v830_v35 = vmul.f32 %v2134_v25, %v800_v8  ;;  %v659_v10 = vadd.f32 %v2322_v43, %v589_v5  ;;  %v678_v36 = vadd.f32 %v2325_v7, %v608_v54  ;;  %v2840_v8 = vld [vmem:[#allocation30_spill] sm:$0xff] }
 0x1fd   : > { %v431_v26 = vadd.f32 %v423_v4, %v360_v48  ;;  %v450_v23 = vadd.f32 %v442_v46, %v379_v0  ;;  %v777_v30 = vpop.permute.xlu1 %776  ;;  %v662_v33 = vadd.f32 %v2366_v2, %v592_v17  ;;  %v681_v6 = vadd.f32 %v2373_v16, %v611_v47  ;;  %v783_v29 = vpop.permute.xlu0 %782  ;;  %v2841_v17 = vld [vmem:[#allocation31_spill] sm:$0xff]  ;;  %v2842_v46 = vld [vmem:[#allocation32_spill] sm:$0xff] }
 0x1fe   : > { %v819_v34 = vadd.f32 %v811_v1, %v660_v41  ;;  %v838_v57 = vadd.f32 %v830_v35, %v679_v39  ;;  %v799_v37 = vsel %vm262_vm5, 0.0, %v777_v30  ;;  %v802_v15 = vsel %vm262_vm5, 0.0, %v783_v29  ;;  %v2843_v35 = vld [vmem:[#allocation35_spill] sm:$0xff] }
 0x1ff   : > { %v557_v43 = vadd.f32 %v2301_v13, %v431_v26  ;;  %v576_v7 = vadd.f32 %v2308_v53, %v450_v23  ;;  %v810_v48 = vmul.f32 %v2829_v40, %v799_v37  ;;  %v829_v0 = vmul.f32 %v2134_v25, %v799_v37  ;;  %v2835_v13 = vld [vmem:[#allocation29_spill] sm:$0xff]  ;;  %v2845_v29 = vld [vmem:[#allocation63_spill] sm:$0xff] }
 0x200   : > { %v813_v2 = vmul.f32 %v2829_v40, %v802_v15  ;;  %v832_v16 = vmul.f32 %v2134_v25, %v802_v15  ;;  %v591_v52 = vadd.f32 %v2143_v31, %v553_v19  ;;  %v610_v41 = vadd.f32 %v2146_v3, %v572_v45  ;;  %v2838_v3 = vld [vmem:[#allocation66_spill] sm:$0xff]  ;;  %v2839_v45 = vld [vmem:[#allocation67_spill] sm:$0xff] }
 0x201   : > { %v818_v39 = vadd.f32 %v810_v48, %v659_v10  ;;  %v837_v61 = vadd.f32 %v829_v0, %v678_v36  ;;  %v781_v11 = vpop.permute.xlu1 %780  ;;  %v594_v38 = vadd.f32 %v2834_v14, %v556_v9  ;;  %v613_v56 = vadd.f32 %v2835_v13, %v575_v58  ;;  %v787_v53 = vpop.permute.xlu0 %786  ;;  %v2846_v0 = vld [vmem:[#allocation39_spill] sm:$0xff]  ;;  %v2849_v14 = vld [vmem:[#allocation41_spill] sm:$0xff] }
 0x202   : > { %v2499_v59 = vadd.f32 %v813_v2, %v662_v33  ;;  %v2501_v42 = vadd.f32 %v832_v16, %v681_v6  ;;  %v661_v49 = vadd.f32 %v2836_v18, %v591_v52  ;;  %v680_v24 = vadd.f32 %v2837_v60, %v610_v41  ;;  %v2844_v33 = vld [vmem:[#allocation62_spill] sm:$0xff]  ;;  %v2847_v16 = vld [vmem:[#allocation43_spill] sm:$0xff]  ;;  %v2850_v13 = vld [vmem:[#allocation33_spill] sm:$0xff] }
 0x203   : > { %v801_v31 = vsel %vm262_vm5, 0.0, %v781_v11  ;;  %v664_v19 = vadd.f32 %v2838_v3, %v594_v38  ;;  %v683_v5 = vadd.f32 %v2839_v45, %v613_v56  ;;  %v804_v9 = vsel %vm262_vm5, 0.0, %v787_v53  ;;  %v2851_v53 = vld [vmem:[#allocation34_spill] sm:$0xff] }
 0x204   : > { %v812_v58 = vmul.f32 %v2829_v40, %v801_v31  ;;  %v831_v22 = vmul.f32 %v2134_v25, %v801_v31  ;;  %v815_v54 = vmul.f32 %v2829_v40, %v804_v9  ;;  %v834_v55 = vmul.f32 %v2134_v25, %v804_v9  ;;  %v2853_v9 = vld [vmem:[#allocation49_spill] sm:$0xff] }
 0x205   : > { %v593_v27 = vadd.f32 %v2840_v8, %v555_v12  ;;  %v612_v44 = vadd.f32 %v2841_v17, %v574_v28  ;;  %v785_v47 = vpop.permute.xlu1 %784  ;;  %v883_v4 = vpop.permute.xlu0 %882  ;;  %v856_v1 = vadd.f32 %v2842_v46, %v818_v39  ;;  %v875_v10 = vadd.f32 %v2843_v35, %v837_v61  ;;  %v2848_v61 = vld [vmem:[#allocation40_spill] sm:$0xff] }
 0x206   : > { %v820_v36 = vadd.f32 %v812_v58, %v661_v49  ;;  %v839_v26 = vadd.f32 %v831_v22, %v680_v24  ;;  %v2519_v23 = vadd.f32 %v815_v54, %v664_v19  ;;  %v2521_v30 = vadd.f32 %v834_v55, %v683_v5  ;;  %v2852_v5 = vld [vmem:[#allocation46_spill] sm:$0xff]  ;;  %v2854_v22 = vld [vmem:[#allocation36_spill] sm:$0xff]  ;;  %v2855_v55 = vld [vmem:[#allocation37_spill] sm:$0xff] }
 0x207   : > { %v663_v6 = vadd.f32 %v2844_v33, %v593_v27  ;;  %v682_v37 = vadd.f32 %v2845_v29, %v612_v44  ;;  %v803_v12 = vsel %vm262_vm5, 0.0, %v785_v47  ;;  %v906_v28 = vsel %vm380_vm6, 0.0, %v883_v4  ;;  %v2856_v44 = vld [vmem:[#allocation47_spill] sm:$0xff]  ;;  %v2857_v4 = vld [vmem:[#allocation48_spill] sm:$0xff]  ;;  %v2859_v33 = vld [vmem:[#allocation65_spill] sm:$0xff] }
 0x208   : > { %v814_v15 = vmul.f32 %v2829_v40, %v803_v12  ;;  %v833_v48 = vmul.f32 %v2134_v25, %v803_v12  ;;  %v2532_v2 = vmul.f32 %v2846_v0, %v906_v28  ;;  %v2535_v52 = vmul.f32 %v2847_v16, %v906_v28 }
 0x209   : > { %v885_v41 = vpop.permute.xlu1 %884  ;;  %v272_v39 = vpop.permute.xlu0 %271  ;;  %v858_v11 = vadd.f32 %v2848_v61, %v820_v36  ;;  %v877_v38 = vadd.f32 %v2849_v14, %v839_v26  ;;  %v2540_v56 = vadd.f32 %v2850_v13, %v819_v34  ;;  %v2543_v18 = vadd.f32 %v2851_v53, %v838_v57  ;;  %v2858_v26 = vld [vmem:[#allocation64_spill] sm:$0xff] }
 0x20a   : > { %v822_v49 = vadd.f32 %v814_v15, %v663_v6  ;;  %v841_v60 = vadd.f32 %v833_v48, %v682_v37  ;;  %v907_v24 = vsel %vm380_vm6, 0.0, %v885_v41  ;;  %v295_v31 = vsel %vm262_vm5, 0.0, %v272_v39  ;;  %v2860_v6 = vld [vmem:[#allocation44_spill] sm:$0xff]  ;;  %v2862_v48 = vld [vmem:[#allocation38_spill] sm:$0xff] }
 0x20b   : > { %v918_v3 = vmul.f32 %v2846_v0, %v907_v24  ;;  %v937_v19 = vmul.f32 %v2847_v16, %v907_v24  ;;  %v306_v45 = vmul.f32 %v2028_v50, %v295_v31  ;;  %v326_v34 = vmul.f32 %v2031_v51, %v295_v31  ;;  %v2863_v39 = vld [vmem:[#allocation42_spill] sm:$0xff] }
 0x20c   : > { %v860_v57 = vadd.f32 %v2852_v5, %v822_v49  ;;  %v879_v58 = vadd.f32 %v2853_v9, %v841_v60  ;;  %v595_v54 = vadd.f32 %v2854_v22, %v557_v43  ;;  %v614_v8 = vadd.f32 %v2855_v55, %v576_v7 }
 0x20d   : > { %v926_v27 = vadd.f32 %v918_v3, %v856_v1  ;;  %v945_v17 = vadd.f32 %v937_v19, %v875_v10  ;;  %v353_v47 = vadd.f32 %v2856_v44, %v306_v45  ;;  %v372_v46 = vadd.f32 %v2857_v4, %v326_v34  ;;  %v889_v35 = vpop.permute.xlu1 %888  ;;  %v382_v50 = vpop.permute.xlu0 %381  ;;  %v2861_v1 = vld [vmem:[#allocation45_spill] sm:$0xff]  ;;  %v2864_v19 = vld [vmem:[#allocation55_spill] sm:$0xff] }
 0x20e   : > { %v909_v51 = vsel %vm380_vm6, 0.0, %v889_v35  ;;  %v405_v36 = vsel %vm380_vm6, 0.0, %v382_v50  ;;  %v665_v43 = vadd.f32 %v2858_v26, %v595_v54  ;;  %v684_v7 = vadd.f32 %v2859_v33, %v614_v8  ;;  %v2865_v34 = vld [vmem:[#allocation57_spill] sm:$0xff]  ;;  %v2868_v33 = vld [vmem:[#allocation58_spill] sm:$0xff] }
 0x20f   : > { %v955_v29 = vadd.f32 %v2860_v6, %v926_v27  ;;  %v982_v10 = vadd.f32 %v2861_v1, %v945_v17  ;;  %v920_v37 = vmul.f32 %v2846_v0, %v909_v51  ;;  %v939_v12 = vmul.f32 %v2847_v16, %v909_v51 }
 0x210   : > { %v416_v28 = vmul.f32 %v2113_v20, %v405_v36  ;;  %v435_v15 = vmul.f32 %v2116_v21, %v405_v36  ;;  %v2576_v41 = vadd.f32 %v2862_v48, %v2499_v59  ;;  %v2580_v61 = vadd.f32 %v2863_v39, %v2501_v42 }
 0x211   : > { %v963_v14 = vmax.f32 %v955_v29, 0.0  ;;  %v990_v13 = vmax.f32 %v982_v10, 0.0  ;;  %v928_v53 = vadd.f32 %v920_v37, %v858_v11  ;;  %v947_v49 = vadd.f32 %v939_v12, %v877_v38  ;;  %v893_v60 = vpop.permute.xlu1 %892  ;;  %v887_v24 = vpop.permute.xlu0 %886  ;;  %v2869_v29 = vld [vmem:[#allocation59_spill] sm:$0xff] }
 0x212   : > { %v424_v31 = vadd.f32 %v416_v28, %v353_v47  ;;  %v443_v3 = vadd.f32 %v435_v15, %v372_v46  ;;  %v911_v20 = vsel %vm380_vm6, 0.0, %v893_v60  ;;  %v908_v21 = vsel %vm380_vm6, 0.0, %v887_v24  ;;  %v2866_v47 = vld [vmem:[#allocation51_spill] sm:$0xff]  ;;  %v2867_v46 = vld [vmem:[#allocation52_spill] sm:$0xff] }
 0x213   : > { %972 = vst.msk [vmem:[%s2586_s30 + $0x8] sm:$0xff] %vm970_vm7, %v963_v14  ;;  %1122 = vst.msk [vmem:[%s2586_s30 + $0x48] sm:$0xff] %vm970_vm7, %v990_v13  ;;  %v957_v59 = vadd.f32 %v2860_v6, %v928_v53  ;;  %v984_v42 = vadd.f32 %v2861_v1, %v947_v49  ;;  %v922_v11 = vmul.f32 %v2846_v0, %v911_v20 }
 0x214   : > { %v941_v38 = vmul.f32 %v2847_v16, %v911_v20  ;;  %v550_v45 = vadd.f32 %v2864_v19, %v424_v31  ;;  %v569_v5 = vadd.f32 %v2865_v34, %v443_v3  ;;  %v919_v9 = vmul.f32 %v2846_v0, %v908_v21  ;;  %v2871_v20 = vld [vmem:[#allocation21_spill] sm:$0xff]  ;;  %v2874_v19 = vld [vmem:[#allocation56_spill] sm:$0xff] }
 0x215   : > { %v938_v22 = vmul.f32 %v2847_v16, %v908_v21  ;;  %v965_v54 = vmax.f32 %v957_v59, 0.0  ;;  %v992_v55 = vmax.f32 %v984_v42, 0.0  ;;  %v930_v8 = vadd.f32 %v922_v11, %v860_v57  ;;  %v789_v17 = vpop.permute.xlu1 %788  ;;  %v891_v44 = vpop.permute.xlu0 %890  ;;  %v2872_v21 = vld [vmem:[#allocation50_spill] sm:$0xff]  ;;  %v2873_v11 = vld [vmem:[#allocation53_spill] sm:$0xff] }
 0x216   : > { %v949_v27 = vadd.f32 %v941_v38, %v879_v58  ;;  %v588_v4 = vadd.f32 %v2866_v47, %v550_v45  ;;  %v607_v35 = vadd.f32 %v2867_v46, %v569_v5  ;;  %v927_v50 = vadd.f32 %v919_v9, %v2540_v56 }
 0x217   : > { %v946_v51 = vadd.f32 %v938_v22, %v2543_v18  ;;  %974 = vst.msk [vmem:[%s2586_s30 + $0x18] sm:$0xff] %vm970_vm7, %v965_v54  ;;  %1124 = vst.msk [vmem:[%s2586_s30 + $0x58] sm:$0xff] %vm970_vm7, %v992_v55  ;;  %v959_v36 = vadd.f32 %v2860_v6, %v930_v8  ;;  %v805_v57 = vsel %vm262_vm5, 0.0, %v789_v17  ;;  %v910_v58 = vsel %vm380_vm6, 0.0, %v891_v44 }
 0x218   : > { %v986_v26 = vadd.f32 %v2861_v1, %v949_v27  ;;  %v658_v56 = vadd.f32 %v2868_v33, %v588_v4  ;;  %v677_v18 = vadd.f32 %v2869_v29, %v607_v35  ;;  %v956_v10 = vadd.f32 %v2860_v6, %v927_v50 }
 0x219   : > { %v983_v37 = vadd.f32 %v2861_v1, %v946_v51  ;;  %v967_v12 = vmax.f32 %v959_v36, 0.0  ;;  %v816_v15 = vmul.f32 %v2829_v40, %v805_v57  ;;  %v835_v48 = vmul.f32 %v2134_v25, %v805_v57  ;;  %v897_v39 = vpop.permute.xlu1 %896  ;;  %v2870_v25 = vld [vmem:[#allocation20_spill] sm:$0xff]  ;;  %v895_v59 = vpop.permute.xlu0 %894 }
 0x21a   : > { %v994_v28 = vmax.f32 %v986_v26, 0.0  ;;  %v817_v14 = vadd.f32 %v2462_v32, %v658_v56  ;;  %v836_v13 = vadd.f32 %v2465_v62, %v677_v18  ;;  %v964_v53 = vmax.f32 %v956_v10, 0.0 }
 0x21b   : > { %v991_v49 = vmax.f32 %v983_v37, 0.0  ;;  %976 = vst.msk [vmem:[%s2586_s30 + $0x28] sm:$0xff] %vm970_vm7, %v967_v12  ;;  %v824_v60 = vadd.f32 %v816_v15, %v665_v43  ;;  %v843_v24 = vadd.f32 %v835_v48, %v684_v7  ;;  %v921_v40 = vmul.f32 %v2846_v0, %v910_v58 }
 0x21c   : > { %1126 = vst.msk [vmem:[%s2586_s30 + $0x68] sm:$0xff] %vm970_vm7, %v994_v28  ;;  %v940_v31 = vmul.f32 %v2847_v16, %v910_v58  ;;  %v855_v3 = vadd.f32 %v2870_v25, %v817_v14  ;;  %v874_v32 = vadd.f32 %v2871_v20, %v836_v13  ;;  %973 = vst.msk [vmem:[%s2586_s30 + $0x10] sm:$0xff] %vm970_vm7, %v964_v53  ;;  %v913_v62 = vsel %vm380_vm6, 0.0, %v897_v39 }
 0x21d   : > { %1123 = vst.msk [vmem:[%s2586_s30 + $0x50] sm:$0xff] %vm970_vm7, %v991_v49  ;;  %v861_v43 = vadd.f32 %v2872_v21, %v2519_v23  ;;  %v929_v7 = vadd.f32 %v921_v40, %v2576_v41  ;;  %v862_v38 = vadd.f32 %v2873_v11, %v824_v60  ;;  %v881_v45 = vadd.f32 %v2874_v19, %v843_v24 }
 0x21e   : > { %v948_v42 = vadd.f32 %v940_v31, %v2580_v61  ;;  %v925_v34 = vadd.f32 %v2532_v2, %v855_v3  ;;  %v944_v5 = vadd.f32 %v2535_v52, %v874_v32  ;;  %v924_v9 = vmul.f32 %v2846_v0, %v913_v62  ;;  %v2875_v61 = vld [vmem:[#allocation54_spill] sm:$0xff] }
 0x21f   : > { %v943_v22 = vmul.f32 %v2847_v16, %v913_v62  ;;  %v958_v23 = vadd.f32 %v2860_v6, %v929_v7  ;;  %v880_v54 = vadd.f32 %v2875_v61, %v2521_v30  ;;  %v912_v55 = vsel %vm380_vm6, 0.0, %v895_v59 }
 0x220   : > { %v985_v41 = vadd.f32 %v2861_v1, %v948_v42  ;;  %v954_v2 = vadd.f32 %v2860_v6, %v925_v34  ;;  %v981_v52 = vadd.f32 %v2861_v1, %v944_v5  ;;  %v932_v8 = vadd.f32 %v924_v9, %v862_v38 }
 0x221   : > { %v951_v27 = vadd.f32 %v943_v22, %v881_v45  ;;  %v966_v17 = vmax.f32 %v958_v23, 0.0  ;;  %v923_v47 = vmul.f32 %v2846_v0, %v912_v55  ;;  %v942_v30 = vmul.f32 %v2847_v16, %v912_v55 }
 0x222   : > { %v993_v44 = vmax.f32 %v985_v41, 0.0  ;;  %v962_v4 = vmax.f32 %v954_v2, 0.0  ;;  %v989_v63 = vmax.f32 %v981_v52, 0.0  ;;  %v961_v46 = vadd.f32 %v2860_v6, %v932_v8 }
 0x223   : > { %v988_v35 = vadd.f32 %v2861_v1, %v951_v27  ;;  %975 = vst.msk [vmem:[%s2586_s30 + $0x20] sm:$0xff] %vm970_vm7, %v966_v17  ;;  %v931_v50 = vadd.f32 %v923_v47, %v861_v43  ;;  %v950_v51 = vadd.f32 %v942_v30, %v880_v54 }
 0x224   : > { %1125 = vst.msk [vmem:[%s2586_s30 + $0x60] sm:$0xff] %vm970_vm7, %v993_v44  ;;  %971 = vst.msk [vmem:[%s2586_s30] sm:$0xff] %vm970_vm7, %v962_v4  ;;  %v969_v0 = vmax.f32 %v961_v46, 0.0 }
 0x225   : > { %1121 = vst.msk [vmem:[%s2586_s30 + $0x40] sm:$0xff] %vm970_vm7, %v989_v63  ;;  %v996_v16 = vmax.f32 %v988_v35, 0.0  ;;  %v960_v36 = vadd.f32 %v2860_v6, %v931_v50  ;;  %v987_v26 = vadd.f32 %v2861_v1, %v950_v51 }
 0x226   : > { %978 = vst.msk [vmem:[%s2586_s30 + $0x38] sm:$0xff] %vm970_vm7, %v969_v0 }
 0x227   : > { %1128 = vst.msk [vmem:[%s2586_s30 + $0x78] sm:$0xff] %vm970_vm7, %v996_v16  ;;  %v968_v57 = vmax.f32 %v960_v36, 0.0  ;;  %v995_v58 = vmax.f32 %v987_v26, 0.0 }
 0x229   : > { %977 = vst.msk [vmem:[%s2586_s30 + $0x30] sm:$0xff] %vm970_vm7, %v968_v57  ;;  %1127 = vst.msk [vmem:[%s2586_s30 + $0x70] sm:$0xff] %vm970_vm7, %v995_v58 }
 0x22a   : > { %1310 = shalt.err (!%p1307_p2)
}
 0x22b   : > { %s1311_s5 = scalar_lea.hbm %s2678_s19, 2048  ;;  %s1315_s4 = scalar_lea.hbm %s2750_s3, 16384 }
 0x22c   : > { %p1312_p4 = scmp.ne.s32.totalorder %s2678_s19, %s1311_s5  ;;  %p1316_p6 = scmp.lt.s32.totalorder %s2678_s19, %s2750_s3 }
 0x22d   : > { %p1317_p11 = scmp.lt.s32.totalorder %s1315_s4, %s1311_s5 }
 0x22e   : > { %p1313_p5 = pnand %p1312_p4, %p1540_p3 }
 0x22f   : > { %p1318_p12 = por %p1317_p11, %p1316_p6 }
 0x230   : > { %p1314_p8 = pneg %p1313_p5 }
 0x232   : > { %p1319_p9 = pnand %p1318_p12, %p1314_p8 }
 0x234   : > { %1322 = shalt.err (!%p1319_p9)
}
 0x235   : > { %s1430_s6 = smov 128   ;;  %s1431_s23 = smov 8  }
 0x236   : > { %1140 = dma.vmem_to_hbm [thread:$0]  (%p1540_p3), %s2680_s10, 2048, %s2678_s19, %s2688_s11, %s1430_s6, %s1430_s6, %s1431_s23  }
 0x237 PF: > { %p1151_p10 = scmp.ge.s32.totalorder %s1419_s28, 2  ;;  %s1038_s22 = sand.u32 1, %s1379_s0  }
 0x238   : > { %s1039_s26 = scalar_lea.sflag [#allocation7], %s1038_s22 }
 0x239   : > { %p1147_p13 = pnand %p1151_p10, %p1553_p7 }
 0x23b   : > { %p1148_p0 = pneg %p1147_p13 }
 0x23d   : > { %1374 = dma.done.wait (%p1148_p0), %s1039_s26, 2048  }
 0x23e   : > { %1376 = vsyncadd (%p1148_p0), %s1039_s26, 4294965248  ;;  %s27_s28 = sadd.s32 1, %s1419_s28   ;;  %s2876_s30 = sld [smem:[#allocation19_spill]] }
 0x23f   : > { %p24_p1 = scmp.ge.s32.totalorder %s27_s28, 10   ;;  %s2877_s21 = sld [smem:[#allocation12_spill]] }
 0x240   : > { %s2878_s22 = sld [smem:[#allocation13_spill]]  ;;  %s2884_s0 = smov %s1383_s1 }
 0x241   : > { %s2879_s23 = sld [smem:[#allocation18_spill]]  ;;  %s2885_s1 = smov %s1387_s20 }
 0x242   : > { %s2880_s24 = sld [smem:[#allocation14_spill]]  ;;  %26 = sbr.rel (!%p24_p1) target bundleno = 25 (0x19), region = 70 }
 0x243   : > { %s2881_s25 = sld [smem:[#allocation15_spill]] }
 0x244   : > { %s2882_s26 = sld [smem:[#allocation16_spill]]  ;;  %s2886_s20 = smov %s2876_s30 }
 0x245   : > { %s2883_s27 = sld [smem:[#allocation17_spill]] }
 0x247   :  { %1044 = vsyncpa [#allocation6], 1 }
 0x248   :  { %1046 = vsyncpa [#allocation6 + $0x1], 1 }
 0x249   :  { %1047 = vsyncpa [#allocation7], 1 }
 0x24a   :  { %1049 = vsyncpa [#allocation7 + $0x1], 1 }

</bundles_post_ra>
